<compile_context>
chip_gen: v7x
topology: tpu7x:2x2x1
jax: 0.10.0
libtpu: 0.0.40
codegen_flags: <defaults>
</compile_context>

<pallas_src>
import math
import functools

import jax
import jax.numpy as jnp
from jax.experimental import pallas as pl
from jax.experimental.pallas import tpu as pltpu

BAG_BLOCK = 8  # bags per grid step -> (8, 128) sublane/lane-dense output stores


def _vae_attention_kernel(x_ref, wfe_ref, bfe_ref, wv_ref, bv_ref,
                          wa1_ref, ba1_ref, wa2_ref, ba2_ref,
                          wc_ref, bc_ref,
                          y_ref, z_ref, *, tau, L, N):
    BG = y_ref.shape[0]          # bags in this block
    R = x_ref.shape[0]           # BG * N instance rows, folded on the sublane axis

    # feature_extractor_part2: Linear -> Dropout(eval=identity) -> ReLU, all rows at once.
    x = x_ref[...]                                                       # (R, F) bf16
    h = jnp.dot(x, wfe_ref[...], preferred_element_type=jnp.float32) + bfe_ref[...]
    h = jnp.maximum(h, 0.0)                                              # (R, L) f32

    # Gated attention: both branches use linear_v's params (as in the reference forward).
    # w_v is lane-padded to 128 with zeros; padded lanes stay exactly 0 through the gate.
    lv = jnp.dot(h.astype(jnp.bfloat16), wv_ref[...],
                 preferred_element_type=jnp.float32) + bv_ref[...]       # (R, 128)
    gate = jnp.tanh(lv) * jax.nn.sigmoid(lv)                             # a_v * a_u

    # attention_weights: Linear(C, A) -> ReLU -> Linear(A, K=1), lane-padded to 128.
    a1 = jnp.dot(gate.astype(jnp.bfloat16), wa1_ref[...],
                 preferred_element_type=jnp.float32) + ba1_ref[...]      # (R, 128)
    a1 = jnp.maximum(a1, 0.0)
    # K=1 head as a VPU multiply + lane reduce (no 1-lane MXU matmul); padded lanes of
    # w_a2 are zero so they contribute nothing.
    a_col = jnp.sum(a1 * wa2_ref[...], axis=1, keepdims=True) + ba2_ref[...]   # (R, 1)

    # Per-bag normalization + temperature softmax over the N instances. The (R,1)->(BG,N,1)
    # reshape is a free leading-dim split (each bag's N rows are whole sublane groups).
    a3 = a_col.reshape(BG, N, 1)
    mean = jnp.sum(a3, axis=1, keepdims=True) / N
    var = jnp.sum((a3 - mean) ** 2, axis=1, keepdims=True) / (N - 1)     # torch.std: unbiased
    a3 = (a3 - mean) / (jnp.sqrt(var) + 1e-8)
    a3 = a3 * (1.0 / (math.sqrt(L) * tau))                               # /sqrt(L), then /tau
    a3 = a3 - jnp.max(a3, axis=1, keepdims=True)
    e = jnp.exp(a3)
    w = e / jnp.sum(e, axis=1, keepdims=True)                            # (BG, N, 1)

    # z = softmax-weights @ h per bag, as broadcast-multiply + sublane-axis sum (keeps the
    # MXU out of a 1-row-per-bag matmul; the XLU slot has slack here).
    h3 = h.reshape(BG, N, L)                                             # free leading split
    z = jnp.sum(w * h3, axis=1)                                          # (BG, L) f32

    # classifier: Linear(L, C_pad) -> Sigmoid; padded columns (zero weight/bias) are
    # sliced off in the wrapper. (BG, 128) result -> full unmasked (8,128) store.
    y = jax.nn.sigmoid(jnp.dot(z.astype(jnp.bfloat16), wc_ref[...],
                               preferred_element_type=jnp.float32) + bc_ref[...])

    z_ref[...] = z
    y_ref[...] = y


def prepare_params(params):
    """One-time glue outside the hot path: transpose weights to (in, out), lift biases to
    (1, out) rows, zero-pad the lane-sparse nr_class / attention_dim / classifier dims to
    128 lanes, and cast MXU operands to bf16 (stats & nonlinearities stay f32 in-kernel)."""
    f32 = lambda a: jnp.asarray(a, jnp.float32)

    C, L = params["w_c"].shape           # nr_class, L
    A = params["w_a1"].shape[0]          # attention_dim
    c_pad = max(128, ((C + 127) // 128) * 128)
    a_pad = max(128, ((A + 127) // 128) * 128)

    def pad2(m, rows, cols):
        m = f32(m)
        return jnp.zeros((rows, cols), jnp.float32).at[:m.shape[0], :m.shape[1]].set(m)

    w_v = pad2(f32(params["w_v"]).T, L, c_pad)                   # (L, 128)
    b_v = pad2(f32(params["b_v"]).reshape(1, -1), 1, c_pad)      # (1, 128)
    w_a1 = pad2(f32(params["w_a1"]).T, c_pad, a_pad)             # (128, 128)
    b_a1 = pad2(f32(params["b_a1"]).reshape(1, -1), 1, a_pad)    # (1, 128)
    w_a2 = pad2(f32(params["w_a2"]).reshape(1, -1), 1, a_pad)    # (1, 128) f32 (VPU row)
    w_c = pad2(f32(params["w_c"]).T, L, c_pad)                   # (L, 128)
    b_c = pad2(f32(params["b_c"]).reshape(1, -1), 1, c_pad)      # (1, 128)

    return dict(
        w_fe=f32(params["w_fe"]).T.astype(jnp.bfloat16),         # (F, L) bf16
        b_fe=f32(params["b_fe"]).reshape(1, -1),                 # (1, L) f32
        w_v=w_v.astype(jnp.bfloat16),  b_v=b_v,
        w_a1=w_a1.astype(jnp.bfloat16), b_a1=b_a1,
        w_a2=w_a2,                                               # f32: VPU multiply+reduce
        b_a2=f32(params["b_a2"]).reshape(1, 1),                  # (1, 1) f32
        w_c=w_c.astype(jnp.bfloat16),  b_c=b_c,
    )


@functools.partial(jax.jit, static_argnames=("tau", "nr_class"))
def vae_attention_forward(x, prep, *, tau, nr_class):
    """x: (num_bags, N, nr_fea) — a stack of bags, each handled exactly like the PyTorch
    module's (1, N, nr_fea) forward. Returns (y (B, nr_class) post-sigmoid, z (B, L))."""
    B, N, F = x.shape
    L = prep["w_fe"].shape[1]
    c_pad = prep["w_c"].shape[1]

    BG = BAG_BLOCK
    B_pad = ((B + BG - 1) // BG) * BG
    x = x.astype(jnp.bfloat16)                       # MXU operand; halves the x DMA bytes
    if B_pad != B:
        x = jnp.pad(x, ((0, B_pad - B), (0, 0), (0, 0)))   # zero bags are NaN-safe
    x = x.reshape(B_pad * N, F)                      # bags folded on the sublane axis

    kernel = functools.partial(_vae_attention_kernel,
                               tau=float(tau), L=int(L), N=int(N))

    def resident(arr):   # weights/biases: constant block index -> DMA'd once, stay in VMEM
        return pl.BlockSpec(arr.shape, lambda g: (0, 0))

    # NOTE (v7x): weight footprint is ~100 KB; if L / N / attention_dim ever grow, budget
    # the resident weights + double-buffered x against 64 MiB VMEM (not 128 MiB).
    y_pad, z_pad = pl.pallas_call(
        kernel,
        grid=(B_pad // BG,),
        out_shape=(jax.ShapeDtypeStruct((B_pad, c_pad), jnp.float32),
                   jax.ShapeDtypeStruct((B_pad, L), jnp.float32)),
        in_specs=[
            pl.BlockSpec((BG * N, F), lambda g: (g, 0)),        # this block's instance rows
            resident(prep["w_fe"]), resident(prep["b_fe"]),
            resident(prep["w_v"]),  resident(prep["b_v"]),
            resident(prep["w_a1"]), resident(prep["b_a1"]),
            resident(prep["w_a2"]), resident(prep["b_a2"]),
            resident(prep["w_c"]),  resident(prep["b_c"]),
        ],
        out_specs=(pl.BlockSpec((BG, c_pad), lambda g: (g, 0)),  # dense (8,128) slabs
                   pl.BlockSpec((BG, L), lambda g: (g, 0))),
        compiler_params=pltpu.CompilerParams(
            dimension_semantics=("parallel",)),                  # v7x megacore if B grows
    )(x, prep["w_fe"], prep["b_fe"], prep["w_v"], prep["b_v"],
      prep["w_a1"], prep["b_a1"], prep["w_a2"], prep["b_a2"],
      prep["w_c"], prep["b_c"])

    return y_pad[:B, :nr_class], z_pad[:B]


if __name__ == "__main__":
    # Shapes consistent with the module: nr_fea=32, L=128 (non-CRC_MIPL), nr_class=4,
    # attention_dim=16, K=1, init_tau=1.0; a batch of 4 bags of 8 instances each.
    B, N, F, L, C, A = 4, 8, 32, 128, 4, 16
    tau = 1.0

    key = jax.random.PRNGKey(0)
    keys = jax.random.split(key, 11)

    def uinit(k, shape, fan_in):
        bound = 1.0 / math.sqrt(fan_in)
        return jax.random.uniform(k, shape, jnp.float32, -bound, bound)

    params = dict(
        w_fe=uinit(keys[0], (L, F), F),  b_fe=uinit(keys[1], (L,), F),
        w_v=uinit(keys[2], (C, L), L),   b_v=uinit(keys[3], (C,), L),
        w_a1=uinit(keys[4], (A, C), C),  b_a1=uinit(keys[5], (A,), C),
        w_a2=uinit(keys[6], (1, A), A),  b_a2=uinit(keys[7], (1,), A),
        w_c=uinit(keys[8], (C, L), L),   b_c=uinit(keys[9], (C,), L),
    )
    x = jax.random.normal(keys[10], (B, N, F), jnp.float32)

    prep = prepare_params(params)                      # one-time, outside the hot path
    y, z = vae_attention_forward(x, prep, tau=tau, nr_class=C)
    jax.block_until_ready((y, z))
    assert y.shape == (B, C) and z.shape == (B, L)

    # Pure-JAX per-bag f32 reference (same quirky semantics: both gated branches use linear_v).
    def ref_one_bag(xb):
        xb = xb.astype(jnp.float32)
        h = jax.nn.relu(xb @ params["w_fe"].T + params["b_fe"])
        lv = h @ params["w_v"].T + params["b_v"]
        gate = jnp.tanh(lv) * jax.nn.sigmoid(lv)
        a1 = jax.nn.relu(gate @ params["w_a1"].T + params["b_a1"])
        a = (a1 @ params["w_a2"].T + params["b_a2"]).T                  # (1, N)
        a = (a - a.mean()) / (jnp.std(a, ddof=1) + 1e-8)
        a = a / math.sqrt(L)
        wrow = jax.nn.softmax(a / tau, axis=1)
        zb = wrow @ h
        yb = jax.nn.sigmoid(zb @ params["w_c"].T + params["b_c"])
        return yb, zb

    refs = [ref_one_bag(x[b]) for b in range(B)]
    y_ref = jnp.concatenate([r[0] for r in refs], axis=0)
    z_ref = jnp.concatenate([r[1] for r in refs], axis=0)

    # bf16 MXU operands vs. the pure-f32 reference: ~1% tolerance is ample headroom.
    assert jnp.allclose(y, y_ref, rtol=2e-2, atol=2e-2), float(jnp.max(jnp.abs(y - y_ref)))
    assert jnp.allclose(z, z_ref, rtol=2e-2, atol=2e-2), float(jnp.max(jnp.abs(z - z_ref)))

    print("KERNEL_OK")
</pallas_src>

<mosaic_0001>
module attributes {stable_mosaic.version = 11 : i64} {
  func.func @_vae_attention_kernel(%arg0: i32, %arg1: memref<64x32xbf16, #tpu.memory_space<vmem>>, %arg2: memref<32x128xbf16, #tpu.memory_space<vmem>>, %arg3: memref<1x128xf32, #tpu.memory_space<vmem>>, %arg4: memref<128x128xbf16, #tpu.memory_space<vmem>>, %arg5: memref<1x128xf32, #tpu.memory_space<vmem>>, %arg6: memref<128x128xbf16, #tpu.memory_space<vmem>>, %arg7: memref<1x128xf32, #tpu.memory_space<vmem>>, %arg8: memref<1x128xf32, #tpu.memory_space<vmem>>, %arg9: memref<1x1xf32, #tpu.memory_space<vmem>>, %arg10: memref<128x128xbf16, #tpu.memory_space<vmem>>, %arg11: memref<1x128xf32, #tpu.memory_space<vmem>>, %arg12: memref<8x128xf32, #tpu.memory_space<vmem>>, %arg13: memref<8x128xf32, #tpu.memory_space<vmem>>) attributes {dimension_semantics = [#tpu.dimension_semantics<parallel>], iteration_bounds = array<i64: 1>, scalar_prefetch = 0 : i64, scratch_operands = 0 : i64, tpu.core_type = #tpu.core_type<tc>, window_params = [{transform_indices = @transform_0, window_bounds = array<i64: 64, 32>}, {pipeline_mode = #tpu.pipeline_mode<synchronous>, transform_indices = @transform_1, window_bounds = array<i64: 32, 128>}, {pipeline_mode = #tpu.pipeline_mode<synchronous>, transform_indices = @transform_2, window_bounds = array<i64: 1, 128>}, {pipeline_mode = #tpu.pipeline_mode<synchronous>, transform_indices = @transform_3, window_bounds = array<i64: 128, 128>}, {pipeline_mode = #tpu.pipeline_mode<synchronous>, transform_indices = @transform_4, window_bounds = array<i64: 1, 128>}, {pipeline_mode = #tpu.pipeline_mode<synchronous>, transform_indices = @transform_5, window_bounds = array<i64: 128, 128>}, {pipeline_mode = #tpu.pipeline_mode<synchronous>, transform_indices = @transform_6, window_bounds = array<i64: 1, 128>}, {pipeline_mode = #tpu.pipeline_mode<synchronous>, transform_indices = @transform_7, window_bounds = array<i64: 1, 128>}, {pipeline_mode = #tpu.pipeline_mode<synchronous>, transform_indices = @transform_8, window_bounds = array<i64: 1, 1>}, {pipeline_mode = #tpu.pipeline_mode<synchronous>, transform_indices = @transform_9, window_bounds = array<i64: 128, 128>}, {pipeline_mode = #tpu.pipeline_mode<synchronous>, transform_indices = @transform_10, window_bounds = array<i64: 1, 128>}, {transform_indices = @transform_11, window_bounds = array<i64: 8, 128>}, {transform_indices = @transform_12, window_bounds = array<i64: 8, 128>}]} {
    %c0 = arith.constant 0 : index
    %c0_0 = arith.constant 0 : index
    %0 = vector.load %arg1[%c0, %c0_0] : memref<64x32xbf16, #tpu.memory_space<vmem>>, vector<64x32xbf16>
    %c0_1 = arith.constant 0 : index
    %c0_2 = arith.constant 0 : index
    %1 = vector.load %arg2[%c0_1, %c0_2] : memref<32x128xbf16, #tpu.memory_space<vmem>>, vector<32x128xbf16>
    %cst = arith.constant dense<0.000000e+00> : vector<64x128xf32>
    %2 = tpu.matmul %0, %1, %cst {dimension_numbers = #tpu.dot_dimension_numbers<[1], [0], [0], [1], [0, 0, 1, 1], [], []>} : vector<64x32xbf16>, vector<32x128xbf16>, vector<64x128xf32> -> vector<64x128xf32>
    %c0_3 = arith.constant 0 : index
    %c0_4 = arith.constant 0 : index
    %3 = vector.load %arg3[%c0_3, %c0_4] : memref<1x128xf32, #tpu.memory_space<vmem>>, vector<1x128xf32>
    %4 = vector.broadcast %3 : vector<1x128xf32> to vector<64x128xf32>
    %5 = arith.addf %2, %4 : vector<64x128xf32>
    %cst_5 = arith.constant 0.000000e+00 : f32
    %6 = vector.broadcast %cst_5 : f32 to vector<64x128xf32>
    %7 = arith.maximumf %5, %6 : vector<64x128xf32>
    %8 = arith.truncf %7 : vector<64x128xf32> to vector<64x128xbf16>
    %c0_6 = arith.constant 0 : index
    %c0_7 = arith.constant 0 : index
    %9 = vector.load %arg4[%c0_6, %c0_7] : memref<128x128xbf16, #tpu.memory_space<vmem>>, vector<128x128xbf16>
    %cst_8 = arith.constant dense<0.000000e+00> : vector<64x128xf32>
    %10 = tpu.matmul %8, %9, %cst_8 {dimension_numbers = #tpu.dot_dimension_numbers<[1], [0], [0], [1], [0, 0, 1, 1], [], []>} : vector<64x128xbf16>, vector<128x128xbf16>, vector<64x128xf32> -> vector<64x128xf32>
    %c0_9 = arith.constant 0 : index
    %c0_10 = arith.constant 0 : index
    %11 = vector.load %arg5[%c0_9, %c0_10] : memref<1x128xf32, #tpu.memory_space<vmem>>, vector<1x128xf32>
    %12 = vector.broadcast %11 : vector<1x128xf32> to vector<64x128xf32>
    %13 = arith.addf %10, %12 : vector<64x128xf32>
    %14 = math.tanh %13 : vector<64x128xf32>
    %15 = arith.negf %13 : vector<64x128xf32>
    %16 = math.exp %15 : vector<64x128xf32>
    %cst_11 = arith.constant 1.000000e+00 : f32
    %17 = vector.broadcast %cst_11 : f32 to vector<64x128xf32>
    %18 = arith.addf %17, %16 : vector<64x128xf32>
    %19 = arith.divf %17, %18 : vector<64x128xf32>
    %20 = arith.mulf %14, %19 : vector<64x128xf32>
    %21 = arith.truncf %20 : vector<64x128xf32> to vector<64x128xbf16>
    %c0_12 = arith.constant 0 : index
    %c0_13 = arith.constant 0 : index
    %22 = vector.load %arg6[%c0_12, %c0_13] : memref<128x128xbf16, #tpu.memory_space<vmem>>, vector<128x128xbf16>
    %cst_14 = arith.constant dense<0.000000e+00> : vector<64x128xf32>
    %23 = tpu.matmul %21, %22, %cst_14 {dimension_numbers = #tpu.dot_dimension_numbers<[1], [0], [0], [1], [0, 0, 1, 1], [], []>} : vector<64x128xbf16>, vector<128x128xbf16>, vector<64x128xf32> -> vector<64x128xf32>
    %c0_15 = arith.constant 0 : index
    %c0_16 = arith.constant 0 : index
    %24 = vector.load %arg7[%c0_15, %c0_16] : memref<1x128xf32, #tpu.memory_space<vmem>>, vector<1x128xf32>
    %25 = vector.broadcast %24 : vector<1x128xf32> to vector<64x128xf32>
    %26 = arith.addf %23, %25 : vector<64x128xf32>
    %cst_17 = arith.constant 0.000000e+00 : f32
    %27 = vector.broadcast %cst_17 : f32 to vector<64x128xf32>
    %28 = arith.maximumf %26, %27 : vector<64x128xf32>
    %c0_18 = arith.constant 0 : index
    %c0_19 = arith.constant 0 : index
    %29 = vector.load %arg8[%c0_18, %c0_19] : memref<1x128xf32, #tpu.memory_space<vmem>>, vector<1x128xf32>
    %30 = vector.broadcast %29 : vector<1x128xf32> to vector<64x128xf32>
    %31 = arith.mulf %28, %30 : vector<64x128xf32>
    %cst_20 = arith.constant dense<0.000000e+00> : vector<64xf32>
    %32 = vector.multi_reduction <add>, %31, %cst_20 [1] : vector<64x128xf32> to vector<64xf32>
    %33 = vector.shape_cast %32 : vector<64xf32> to vector<64x1xf32>
    %c0_21 = arith.constant 0 : index
    %c0_22 = arith.constant 0 : index
    %34 = vector.load %arg9[%c0_21, %c0_22] : memref<1x1xf32, #tpu.memory_space<vmem>>, vector<1x1xf32>
    %35 = vector.broadcast %34 : vector<1x1xf32> to vector<64x1xf32>
    %36 = arith.addf %33, %35 : vector<64x1xf32>
    %37 = vector.shape_cast %36 : vector<64x1xf32> to vector<8x8x1xf32>
    %cst_23 = arith.constant dense<0.000000e+00> : vector<8x1xf32>
    %38 = vector.multi_reduction <add>, %37, %cst_23 [1] : vector<8x8x1xf32> to vector<8x1xf32>
    %39 = vector.shape_cast %38 : vector<8x1xf32> to vector<8x1x1xf32>
    %cst_24 = arith.constant 8.000000e+00 : f32
    %40 = vector.broadcast %cst_24 : f32 to vector<8x1x1xf32>
    %41 = arith.divf %39, %40 : vector<8x1x1xf32>
    %42 = vector.broadcast %41 : vector<8x1x1xf32> to vector<8x8x1xf32>
    %43 = arith.subf %37, %42 : vector<8x8x1xf32>
    %44 = arith.mulf %43, %43 : vector<8x8x1xf32>
    %cst_25 = arith.constant dense<0.000000e+00> : vector<8x1xf32>
    %45 = vector.multi_reduction <add>, %44, %cst_25 [1] : vector<8x8x1xf32> to vector<8x1xf32>
    %46 = vector.shape_cast %45 : vector<8x1xf32> to vector<8x1x1xf32>
    %cst_26 = arith.constant 7.000000e+00 : f32
    %47 = vector.broadcast %cst_26 : f32 to vector<8x1x1xf32>
    %48 = arith.divf %46, %47 : vector<8x1x1xf32>
    %49 = vector.broadcast %41 : vector<8x1x1xf32> to vector<8x8x1xf32>
    %50 = arith.subf %37, %49 : vector<8x8x1xf32>
    %51 = math.sqrt %48 : vector<8x1x1xf32>
    %cst_27 = arith.constant 9.99999993E-9 : f32
    %52 = vector.broadcast %cst_27 : f32 to vector<8x1x1xf32>
    %53 = arith.addf %51, %52 : vector<8x1x1xf32>
    %54 = vector.broadcast %53 : vector<8x1x1xf32> to vector<8x8x1xf32>
    %55 = arith.divf %50, %54 : vector<8x8x1xf32>
    %cst_28 = arith.constant 0.0883883461 : f32
    %56 = vector.broadcast %cst_28 : f32 to vector<8x8x1xf32>
    %57 = arith.mulf %55, %56 : vector<8x8x1xf32>
    %cst_29 = arith.constant dense<0xFF800000> : vector<8x1xf32>
    %58 = vector.multi_reduction <maximumf>, %57, %cst_29 [1] : vector<8x8x1xf32> to vector<8x1xf32>
    %59 = vector.shape_cast %58 : vector<8x1xf32> to vector<8x1x1xf32>
    %60 = vector.broadcast %59 : vector<8x1x1xf32> to vector<8x8x1xf32>
    %61 = arith.subf %57, %60 : vector<8x8x1xf32>
    %62 = math.exp %61 : vector<8x8x1xf32>
    %cst_30 = arith.constant dense<0.000000e+00> : vector<8x1xf32>
    %63 = vector.multi_reduction <add>, %62, %cst_30 [1] : vector<8x8x1xf32> to vector<8x1xf32>
    %64 = vector.shape_cast %63 : vector<8x1xf32> to vector<8x1x1xf32>
    %65 = vector.broadcast %64 : vector<8x1x1xf32> to vector<8x8x1xf32>
    %66 = arith.divf %62, %65 : vector<8x8x1xf32>
    %67 = vector.shape_cast %7 : vector<64x128xf32> to vector<8x8x128xf32>
    %68 = vector.broadcast %66 : vector<8x8x1xf32> to vector<8x8x128xf32>
    %69 = arith.mulf %68, %67 : vector<8x8x128xf32>
    %cst_31 = arith.constant dense<0.000000e+00> : vector<8x128xf32>
    %70 = vector.multi_reduction <add>, %69, %cst_31 [1] : vector<8x8x128xf32> to vector<8x128xf32>
    %71 = arith.truncf %70 : vector<8x128xf32> to vector<8x128xbf16>
    %c0_32 = arith.constant 0 : index
    %c0_33 = arith.constant 0 : index
    %72 = vector.load %arg10[%c0_32, %c0_33] : memref<128x128xbf16, #tpu.memory_space<vmem>>, vector<128x128xbf16>
    %cst_34 = arith.constant dense<0.000000e+00> : vector<8x128xf32>
    %73 = tpu.matmul %71, %72, %cst_34 {dimension_numbers = #tpu.dot_dimension_numbers<[1], [0], [0], [1], [0, 0, 1, 1], [], []>} : vector<8x128xbf16>, vector<128x128xbf16>, vector<8x128xf32> -> vector<8x128xf32>
    %c0_35 = arith.constant 0 : index
    %c0_36 = arith.constant 0 : index
    %74 = vector.load %arg11[%c0_35, %c0_36] : memref<1x128xf32, #tpu.memory_space<vmem>>, vector<1x128xf32>
    %75 = vector.broadcast %74 : vector<1x128xf32> to vector<8x128xf32>
    %76 = arith.addf %73, %75 : vector<8x128xf32>
    %77 = arith.negf %76 : vector<8x128xf32>
    %78 = math.exp %77 : vector<8x128xf32>
    %cst_37 = arith.constant 1.000000e+00 : f32
    %79 = vector.broadcast %cst_37 : f32 to vector<8x128xf32>
    %80 = arith.addf %79, %78 : vector<8x128xf32>
    %81 = arith.divf %79, %80 : vector<8x128xf32>
    %c0_38 = arith.constant 0 : index
    %c0_39 = arith.constant 0 : index
    %82 = vector.load %arg13[%c0_38, %c0_39] : memref<8x128xf32, #tpu.memory_space<vmem>>, vector<8x128xf32>
    tpu.vector_store %arg13[%c0_38, %c0_39], %70 {strides = array<i32>} : memref<8x128xf32, #tpu.memory_space<vmem>>, vector<8x128xf32>,
    %c0_40 = arith.constant 0 : index
    %c0_41 = arith.constant 0 : index
    %83 = vector.load %arg12[%c0_40, %c0_41] : memref<8x128xf32, #tpu.memory_space<vmem>>, vector<8x128xf32>
    tpu.vector_store %arg12[%c0_40, %c0_41], %81 {strides = array<i32>} : memref<8x128xf32, #tpu.memory_space<vmem>>, vector<8x128xf32>,
    return
  }
  func.func @transform_0(%arg0: i32) -> (i32, i32) {
    %c0_i32 = arith.constant 0 : i32
    %c0_i32_0 = arith.constant 0 : i32
    return %arg0, %c0_i32 : i32, i32
  }
  func.func @transform_1(%arg0: i32) -> (i32, i32) {
    %c0_i32 = arith.constant 0 : i32
    %c0_i32_0 = arith.constant 0 : i32
    %c0_i32_1 = arith.constant 0 : i32
    return %c0_i32, %c0_i32_0 : i32, i32
  }
  func.func @transform_2(%arg0: i32) -> (i32, i32) {
    %c0_i32 = arith.constant 0 : i32
    %c0_i32_0 = arith.constant 0 : i32
    %c0_i32_1 = arith.constant 0 : i32
    return %c0_i32, %c0_i32_0 : i32, i32
  }
  func.func @transform_3(%arg0: i32) -> (i32, i32) {
    %c0_i32 = arith.constant 0 : i32
    %c0_i32_0 = arith.constant 0 : i32
    %c0_i32_1 = arith.constant 0 : i32
    return %c0_i32, %c0_i32_0 : i32, i32
  }
  func.func @transform_4(%arg0: i32) -> (i32, i32) {
    %c0_i32 = arith.constant 0 : i32
    %c0_i32_0 = arith.constant 0 : i32
    %c0_i32_1 = arith.constant 0 : i32
    return %c0_i32, %c0_i32_0 : i32, i32
  }
  func.func @transform_5(%arg0: i32) -> (i32, i32) {
    %c0_i32 = arith.constant 0 : i32
    %c0_i32_0 = arith.constant 0 : i32
    %c0_i32_1 = arith.constant 0 : i32
    return %c0_i32, %c0_i32_0 : i32, i32
  }
  func.func @transform_6(%arg0: i32) -> (i32, i32) {
    %c0_i32 = arith.constant 0 : i32
    %c0_i32_0 = arith.constant 0 : i32
    %c0_i32_1 = arith.constant 0 : i32
    return %c0_i32, %c0_i32_0 : i32, i32
  }
  func.func @transform_7(%arg0: i32) -> (i32, i32) {
    %c0_i32 = arith.constant 0 : i32
    %c0_i32_0 = arith.constant 0 : i32
    %c0_i32_1 = arith.constant 0 : i32
    return %c0_i32, %c0_i32_0 : i32, i32
  }
  func.func @transform_8(%arg0: i32) -> (i32, i32) {
    %c0_i32 = arith.constant 0 : i32
    %c0_i32_0 = arith.constant 0 : i32
    %c0_i32_1 = arith.constant 0 : i32
    return %c0_i32, %c0_i32_0 : i32, i32
  }
  func.func @transform_9(%arg0: i32) -> (i32, i32) {
    %c0_i32 = arith.constant 0 : i32
    %c0_i32_0 = arith.constant 0 : i32
    %c0_i32_1 = arith.constant 0 : i32
    return %c0_i32, %c0_i32_0 : i32, i32
  }
  func.func @transform_10(%arg0: i32) -> (i32, i32) {
    %c0_i32 = arith.constant 0 : i32
    %c0_i32_0 = arith.constant 0 : i32
    %c0_i32_1 = arith.constant 0 : i32
    return %c0_i32, %c0_i32_0 : i32, i32
  }
  func.func @transform_11(%arg0: i32) -> (i32, i32) {
    %c0_i32 = arith.constant 0 : i32
    %c0_i32_0 = arith.constant 0 : i32
    return %arg0, %c0_i32 : i32, i32
  }
  func.func @transform_12(%arg0: i32) -> (i32, i32) {
    %c0_i32 = arith.constant 0 : i32
    %c0_i32_0 = arith.constant 0 : i32
    return %arg0, %c0_i32 : i32, i32
  }
}

</mosaic_0001>

<bundles_post_ra>
// kernel: vae_attention_forward.1
= control target key start
LH: loop header
LB: loop body
LE: loop exit
PB: predicated region body
PF: predicated region fallthrough
CT: control target
= control target key end

     0   :  { %s2009_s0 = inlined_call_operand.vmem [shape: bf16[64,32], index: 0, kind: input, shape index: {}]   ;;  %s2010_s1 = inlined_call_operand.vmem [shape: bf16[32,128], index: 1, kind: input, shape index: {}]   ;;  %s2011_s2 = inlined_call_operand.vmem [shape: f32[1,128], index: 2, kind: input, shape index: {}]   ;;  %s2012_s3 = inlined_call_operand.vmem [shape: bf16[128,128], index: 3, kind: input, shape index: {}]   ;;  %s2013_s4 = inlined_call_operand.vmem [shape: f32[1,128], index: 4, kind: input, shape index: {}]   ;;  %s2014_s5 = inlined_call_operand.hbm [shape: bf16[128,128], index: 5, kind: input, shape index: {}]   ;;  %s2015_s6 = inlined_call_operand.vmem [shape: f32[1,128], index: 6, kind: input, shape index: {}]   ;;  %s2016_s7 = inlined_call_operand.vmem [shape: f32[1,128], index: 7, kind: input, shape index: {}]   ;;  %s2017_s8 = inlined_call_operand.<no memory space> [shape: f32[1,1], index: 8, kind: input, shape index: {}]   ;;  %s2018_s9 = inlined_call_operand.hbm [shape: bf16[128,128], index: 9, kind: input, shape index: {}]   ;;  %s2019_s10 = inlined_call_operand.vmem [shape: f32[1,128], index: 10, kind: input, shape index: {}]   ;;  %s2020_s11 = inlined_call_operand.vmem [shape: f32[8,128], index: 11, kind: output, shape index: {0}]   ;;  %s2021_s12 = inlined_call_operand.vmem [shape: f32[8,128], index: 12, kind: output, shape index: {1}]  }
   0x1   :  { %v18_v0 = vstv %s2017_s8 }
   0x2   :  { %19 = vst [vmem:[#allocation2] sm:$0x1] %v18_v0 }
   0x3   :  { %20 = vsyncpa [#allocation4], 0 }
   0x4   :  { %21 = vsyncpa [#allocation6], 0  ;;  %s1645_s23 = smov [#allocation3]   ;;  %s1597_s27 = scalar_lea.hbm %s2014_s5, 1024 }
   0x5   :  { %s37_s24 = sshll.u32 %s1645_s23, 4  ;;  %p1598_p0 = scmp.ne.s32.totalorder %s2014_s5, %s1597_s27  ;;  %s38_s24 = int_to_ptr.vmem [resolvable:$true] %s37_s24 }
   0x6   :  { %p1601_p1 = scmp.lt.u32.totalorder %s1597_s27, %s2014_s5 }
   0x8   :  { %p1603_p2 = pnand %p1601_p1, %p1598_p0 }
   0xa   :  { %1606 = shalt.err (!%p1603_p2)
}
   0xb   :  { %s1607_s8 = scalar_lea.vmem %s38_s24, 1024  ;;  %p1612_p4 = scmp.lt.s32.totalorder %s38_s24, %s38_s24 }
   0xc   :  { %p1608_p3 = scmp.ne.s32.totalorder %s38_s24, %s1607_s8  ;;  %p1613_p5 = scmp.lt.s32.totalorder %s1607_s8, %s1607_s8 }
   0xe   :  { %p1614_p6 = por %p1613_p5, %p1612_p4 }
  0x10   :  { %p1615_p7 = pnand %p1614_p6, %p1608_p3 }
  0x12   :  { %1618 = shalt.err (!%p1615_p7)
}
  0x13   :  { %s1646_s14 = smov 64   ;;  %s1647_s15 = smov 4  }
  0x14   :  { %43 = dma.hbm_to_vmem [thread:$0]  %s2014_s5, 1024, %s38_s24, [#allocation4], %s1646_s14, %s1646_s14, %s1647_s15  }
  0x15   :  { %s1648_s18 = smov [#allocation5]   ;;  %s1619_s22 = scalar_lea.hbm %s2018_s9, 1024 }
  0x16   :  { %s55_s19 = sshll.u32 %s1648_s18, 4  ;;  %p1620_p8 = scmp.ne.s32.totalorder %s2018_s9, %s1619_s22  ;;  %s56_s19 = int_to_ptr.vmem [resolvable:$true] %s55_s19 }
  0x17   :  { %p1623_p9 = scmp.lt.u32.totalorder %s1619_s22, %s2018_s9 }
  0x19   :  { %p1625_p10 = pnand %p1623_p9, %p1620_p8 }
  0x1b   :  { %1628 = shalt.err (!%p1625_p10)
}
  0x1c   :  { %s1629_s28 = scalar_lea.vmem %s56_s19, 1024  ;;  %p1634_p12 = scmp.lt.s32.totalorder %s56_s19, %s56_s19 }
  0x1d   :  { %p1630_p11 = scmp.ne.s32.totalorder %s56_s19, %s1629_s28  ;;  %p1635_p13 = scmp.lt.s32.totalorder %s1629_s28, %s1629_s28 }
  0x1f   :  { %p1636_p0 = por %p1635_p13, %p1634_p12 }
  0x21   :  { %p1637_p1 = pnand %p1636_p0, %p1630_p11 }
  0x23   :  { %1640 = shalt.err (!%p1637_p1)
}
  0x24   :  { %61 = dma.hbm_to_vmem [thread:$0]  %s2018_s9, 1024, %s56_s19, [#allocation6], %s1646_s14, %s1646_s14, %s1647_s15  }
  0x25   :  { %1641 = dma.done.wait [#allocation4], 1024  }
  0x26   :  { %1642 = vsyncadd [#allocation4], 4294966272 }
  0x27   :  { %1643 = dma.done.wait [#allocation6], 1024  }
  0x28   :  { %1644 = vsyncadd [#allocation6], 4294966272  ;;  %v1451_v1 = vld [vmem:[%s2010_s1] sm:$0xff]   ;;  %v1452_v2 = vld [vmem:[%s2010_s1 + $0x8] sm:$0xff]   ;;  %vm122_vm0 = vcmask 261120   ;;  %vm606_vm1 = vcmask 7168  }
  0x29   :  { %1362 = vmatprep.subr.bf16.mxu0 %v1451_v1  ;;  %v1453_v3 = vld [vmem:[%s2009_s0] sm:$0xff]   ;;  %v1454_v4 = vld [vmem:[%s2009_s0 + $0x8] sm:$0xff]   ;;  %v1455_v5 = vld [vmem:[%s2009_s0 + $0x10] sm:$0xff]  }
  0x2a   :  { %1363 = vmatpush3.bf16.msra.mxu0 %v1451_v1  ;;  %1366 = vmatprep.mubr.msk.bf16.mxu0 %vm122_vm0, %v1453_v3  ;;  %v1457_v6 = vld [vmem:[%s2012_s3] sm:$0xff]   ;;  %v1458_v7 = vld [vmem:[%s2012_s3 + $0x8] sm:$0xff]   ;;  %v1459_v8 = vld [vmem:[%s2012_s3 + $0x10] sm:$0xff]  }
  0x2b   :  { %1364 = vmatprep.subr.bf16.mxu0 %v1452_v2  ;;  %1374 = vmatprep.subr.bf16.mxu1 %v1457_v6  ;;  %v1456_v9 = vld [vmem:[%s2009_s0 + $0x18] sm:$0xff]   ;;  %v1461_v11 = vld [vmem:[%s2012_s3 + $0x20] sm:$0xff]   ;;  %v1462_v12 = vld [vmem:[%s2012_s3 + $0x28] sm:$0xff]  }
  0x2c   :  { %1375 = vmatpush3.bf16.msra.mxu1 %v1457_v6  ;;  %v1460_v10 = vld [vmem:[%s2012_s3 + $0x18] sm:$0xff]   ;;  %v1463_v13 = vld [vmem:[%s2012_s3 + $0x30] sm:$0xff]   ;;  %v1274_v15 = vld [vmem:[%s2011_s2] ss:$0 sm:$0xff] }
  0x2d   :  { %1376 = vmatprep.subr.bf16.mxu1 %v1458_v7  ;;  %v1464_v14 = vld [vmem:[%s2012_s3 + $0x38] sm:$0xff]   ;;  %v1465_v44 = vld [vmem:[#allocation3] sm:$0xff]   ;;  %v1466_v45 = vld [vmem:[#allocation3 + $0x8] sm:$0xff]  }
  0x2e   :  { %1365 = vmatpush3.bf16.msra.mxu0 %v1452_v2  ;;  %v1467_v46 = vld [vmem:[#allocation3 + $0x10] sm:$0xff]   ;;  %v1468_v47 = vld [vmem:[#allocation3 + $0x18] sm:$0xff]   ;;  %v1469_v48 = vld [vmem:[#allocation3 + $0x20] sm:$0xff]  }
  0x2f   :  { %1398 = vmatprep.subr.bf16.mxu0 %v1465_v44  ;;  %v1470_v49 = vld [vmem:[#allocation3 + $0x28] sm:$0xff]   ;;  %v1471_v50 = vld [vmem:[#allocation3 + $0x30] sm:$0xff]   ;;  %v1472_v51 = vld [vmem:[#allocation3 + $0x38] sm:$0xff]  }
  0x30   :  { %1377 = vmatpush3.bf16.msra.mxu1 %v1458_v7  ;;  %v1285_v52 = vld [vmem:[%s2013_s4] ss:$0 sm:$0xff] }
  0x31   :  { %1367 = vmatmul.mubr.msk.bf16.vlgmr.msra.gmra.mrb[0].mxu0 %vm122_vm0, %v1454_v4  ;;  %1378 = vmatprep.subr.bf16.mxu1 %v1459_v8 }
  0x32   :  { %1370 = vmatprep.mubr.msk.bf16.mxu0 %vm122_vm0, %v1455_v5  ;;  %1399 = vmatpush3.bf16.msra.mxu0 %v1465_v44 }
  0x33   :  { %1400 = vmatprep.subr.bf16.mxu0 %v1466_v45 }
  0x34   :  { %1379 = vmatpush3.bf16.msra.mxu1 %v1459_v8 }
  0x35   :  { %1380 = vmatprep.subr.bf16.mxu1 %v1460_v10 }
  0x36   :  { %1401 = vmatpush3.bf16.msra.mxu0 %v1466_v45 }
  0x37   :  { %1402 = vmatprep.subr.bf16.mxu0 %v1467_v46 }
  0x38   :  { %1381 = vmatpush3.bf16.msra.mxu1 %v1460_v10 }
  0x39   :  { %1371 = vmatmul.mubr.msk.bf16.gmra.mrb[4].mxu0 %vm122_vm0, %v1456_v9  ;;  %1382 = vmatprep.subr.bf16.mxu1 %v1461_v11 }
  0x3a   :  { %1403 = vmatpush3.bf16.msra.mxu0 %v1467_v46 }
  0x3b   :  { %1404 = vmatprep.subr.bf16.mxu0 %v1468_v47 }
  0x3c   :  { %1383 = vmatpush3.bf16.msra.mxu1 %v1461_v11 }
  0x3d   :  { %1384 = vmatprep.subr.bf16.mxu1 %v1462_v12 }
  0x3e   :  { %1405 = vmatpush3.bf16.msra.mxu0 %v1468_v47 }
  0x3f   :  { %1406 = vmatprep.subr.bf16.mxu0 %v1469_v48 }
  0x40   :  { %1385 = vmatpush3.bf16.msra.mxu1 %v1462_v12 }
  0x41   :  { %1386 = vmatprep.subr.bf16.mxu1 %v1463_v13 }
  0x42   :  { %1407 = vmatpush3.bf16.msra.mxu0 %v1469_v48 }
  0x43   :  { %1408 = vmatprep.subr.bf16.mxu0 %v1470_v49 }
  0x44   :  { %1387 = vmatpush3.bf16.msra.mxu1 %v1463_v13 }
  0x45   :  { %1388 = vmatprep.subr.bf16.mxu1 %v1464_v14 }
  0x46   :  { %1409 = vmatpush3.bf16.msra.mxu0 %v1470_v49 }
  0x47   :  { %1410 = vmatprep.subr.bf16.mxu0 %v1471_v50 }
  0x48   :  { %1389 = vmatpush3.bf16.msra.mxu1 %v1464_v14 }
  0x4a   :  { %1411 = vmatpush3.bf16.msra.mxu0 %v1471_v50 }
  0x4b   :  { %1412 = vmatprep.subr.bf16.mxu0 %v1472_v51 }
  0x4e   :  { %1413 = vmatpush3.bf16.msra.mxu0 %v1472_v51 }
 0x104   :  { %v1368_v16 = vpop.f32.mrb[0].mxu0 }
 0x105   :  { %v169_v17 = vpop.f32.mrb[1].mxu0  ;;  %v1795_v20 = vadd.f32 %v1368_v16, %v1274_v15 }
 0x106   :  { %v1793_v18 = vadd.f32 %v1274_v15, %v169_v17  ;;  %v1369_v19 = vpop.f32.mrb[2].mxu0 }
 0x107   :  { %v1797_v21 = vadd.f32 %v1369_v19, %v1274_v15  ;;  %v172_v22 = vpop.f32.mrb[3].mxu0  ;;  %v202_v27 = vmax.f32 %v1795_v20, 0.0 }
 0x108   :  { %v1799_v23 = vadd.f32 %v1274_v15, %v172_v22  ;;  %v200_v25 = vmax.f32 %v1793_v18, 0.0 }
 0x109   :  { %v203_v24 = vmax.f32 %v1797_v21, 0.0 }
 0x10a   :  { %v201_v26 = vmax.f32 %v1799_v23, 0.0 }
 0x10b   :  { %v209_v30 = vpack.c.bf16 %v203_v24, %v202_v27 }
 0x10c   :  { %v1372_v28 = vpop.f32.mrb[4].mxu0  ;;  %v208_v29 = vpack.c.bf16 %v201_v26, %v200_v25 }
 0x10d   :  { %v185_v31 = vpop.f32.mrb[5].mxu0  ;;  %v1815_v34 = vadd.f32 %v1372_v28, %v1274_v15 }
 0x10e   :  { %v1813_v32 = vadd.f32 %v1274_v15, %v185_v31  ;;  %v1373_v33 = vpop.f32.mrb[6].mxu0  ;;  %1390 = vmatprep.mubr.bf16.mxu1 %v208_v29 }
 0x10f   :  { %v1817_v35 = vadd.f32 %v1373_v33, %v1274_v15  ;;  %v188_v36 = vpop.f32.mrb[7].mxu0  ;;  %1391 = vmatmul.mubr.bf16.vlgmr.msra.gmra.mrb[0].mxu1 %v209_v30  ;;  %v206_v41 = vmax.f32 %v1815_v34, 0.0 }
 0x110   :  { %v1819_v37 = vadd.f32 %v1274_v15, %v188_v36  ;;  %v204_v39 = vmax.f32 %v1813_v32, 0.0 }
 0x111   :  { %v207_v38 = vmax.f32 %v1817_v35, 0.0 }
 0x112   :  { %v205_v40 = vmax.f32 %v1819_v37, 0.0 }
 0x113   :  { %v211_v43 = vpack.c.bf16 %v207_v38, %v206_v41 }
 0x114   :  { %v210_v42 = vpack.c.bf16 %v205_v40, %v204_v39 }
 0x116   :  { %1394 = vmatprep.mubr.bf16.mxu1 %v210_v42 }
 0x117   :  { %1395 = vmatmul.mubr.bf16.gmra.mrb[4].mxu1 %v211_v43 }
 0x1e2   :  { %v1392_v53 = vpop.f32.mrb[0].mxu1 }
 0x1e3   :  { %v326_v54 = vadd.f32 %v1392_v53, %v1285_v52  ;;  %v317_v55 = vpop.f32.mrb[1].mxu1 }
 0x1e4   :  { %v318_v56 = vadd.f32 %v1285_v52, %v317_v55  ;;  %v1393_v57 = vpop.f32.mrb[2].mxu1 }
 0x1e5   :  { %v1296_v58 = vmul.f32 -1.442695, %v326_v54  ;;  %v329_v59 = vadd.f32 %v1393_v57, %v1285_v52  ;;  %v320_v60 = vpop.f32.mrb[3].mxu1 }
 0x1e6   :  { %v1294_v61 = vmul.f32 -1.442695, %v318_v56  ;;  %v321_v62 = vadd.f32 %v1285_v52, %v320_v60 }
 0x1e7   :  { %1481 = vpow2.f32 %v1296_v58  ;;  %v1297_v63 = vmul.f32 -1.442695, %v329_v59 }
 0x1e8   :  { %1483 = vpow2.f32 %v1294_v61  ;;  %v1295_v0 = vmul.f32 -1.442695, %v321_v62 }
 0x1e9   :  { %1485 = vpow2.f32 %v1297_v63 }
 0x1ea   :  { %v1396_v1 = vpop.f32.mrb[4].mxu1  ;;  %1487 = vpow2.f32 %v1295_v0 }
 0x1eb   :  { %v342_v2 = vadd.f32 %v1396_v1, %v1285_v52  ;;  %v333_v3 = vpop.f32.mrb[5].mxu1  ;;  %1489 = vtanh.f32 %v326_v54 }
 0x1ec   :  { %v334_v4 = vadd.f32 %v1285_v52, %v333_v3  ;;  %v1397_v5 = vpop.f32.mrb[6].mxu1 }
 0x1ed   :  { %v1300_v6 = vmul.f32 -1.442695, %v342_v2  ;;  %v345_v7 = vadd.f32 %v1397_v5, %v1285_v52  ;;  %v336_v8 = vpop.f32.mrb[7].mxu1 }
 0x1ee   :  { %v1298_v9 = vmul.f32 -1.442695, %v334_v4  ;;  %v337_v10 = vadd.f32 %v1285_v52, %v336_v8 }
 0x1ef   :  { %1491 = vpow2.f32 %v1300_v6  ;;  %v1301_v11 = vmul.f32 -1.442695, %v345_v7 }
 0x1f0   :  { %1493 = vpow2.f32 %v1298_v9  ;;  %v1299_v15 = vmul.f32 -1.442695, %v337_v10  ;;  %v1302_v9 = vld [vmem:[%s2015_s6] ss:$0 sm:$0xff] }
 0x1f1   :  { %v1482_v12 = vpop.eup %1481  ;;  %1495 = vtanh.f32 %v318_v56 }
 0x1f2   :  { %v1484_v13 = vpop.eup %1483  ;;  %v382_v14 = vadd.f32 1.0, %v1482_v12  ;;  %1497 = vpow2.f32 %v1301_v11 }
 0x1f3   :  { %v380_v16 = vadd.f32 1.0, %v1484_v13  ;;  %1499 = vtanh.f32 %v329_v59  ;;  %v1486_v17 = vpop.eup %1485 }
 0x1f4   :  { %1501 = vrcp.f32 %v382_v14  ;;  %v383_v19 = vadd.f32 1.0, %v1486_v17  ;;  %v1488_v22 = vpop.eup %1487 }
 0x1f5   :  { %1503 = vrcp.f32 %v380_v16  ;;  %v381_v28 = vadd.f32 1.0, %v1488_v22  ;;  %v1490_v29 = vpop.eup %1489 }
 0x1f6   :  { %1505 = vpow2.f32 %v1299_v15  ;;  %v1311_v15 = vld [vmem:[%s2016_s7] ss:$0 sm:$0xff] }
 0x1f7   :  { %1507 = vrcp.f32 %v383_v19 }
 0x1f8   :  { %1509 = vtanh.f32 %v321_v62 }
 0x1f9   :  { %v1492_v30 = vpop.eup %1491  ;;  %1511 = vrcp.f32 %v381_v28 }
 0x1fa   :  { %v1494_v31 = vpop.eup %1493  ;;  %v386_v33 = vadd.f32 1.0, %v1492_v30  ;;  %1513 = vtanh.f32 %v342_v2 }
 0x1fb   :  { %v1496_v36 = vpop.eup %1495  ;;  %v384_v44 = vadd.f32 1.0, %v1494_v31 }
 0x1fc   :  { %v1498_v42 = vpop.eup %1497  ;;  %1515 = vrcp.f32 %v386_v33 }
 0x1fd   :  { %v1500_v43 = vpop.eup %1499  ;;  %v387_v45 = vadd.f32 1.0, %v1498_v42  ;;  %1517 = vtanh.f32 %v345_v7 }
 0x1fe   :  { %v1502_v46 = vpop.eup %1501 }
 0x1ff   :  { %v1504_v47 = vpop.eup %1503  ;;  %1519 = vrcp.f32 %v387_v45  ;;  %v406_v52 = vmul.f32 %v1502_v46, %v1490_v29 }
 0x200   :  { %v1506_v48 = vpop.eup %1505  ;;  %1521 = vtanh.f32 %v334_v4  ;;  %v404_v55 = vmul.f32 %v1504_v47, %v1496_v36 }
 0x201   :  { %v1508_v49 = vpop.eup %1507  ;;  %1523 = vrcp.f32 %v384_v44  ;;  %v385_v50 = vadd.f32 1.0, %v1506_v48 }
 0x202   :  { %v1510_v51 = vpop.eup %1509  ;;  %v407_v53 = vmul.f32 %v1508_v49, %v1500_v43  ;;  %1525 = vtanh.f32 %v337_v10 }
 0x203   :  { %v1512_v54 = vpop.eup %1511  ;;  %1527 = vrcp.f32 %v385_v50 }
 0x204   :  { %v405_v56 = vmul.f32 %v1512_v54, %v1510_v51  ;;  %v413_v57 = vpack.c.bf16 %v407_v53, %v406_v52  ;;  %v1514_v58 = vpop.eup %1513 }
 0x206   :  { %v412_v59 = vpack.c.bf16 %v405_v56, %v404_v55  ;;  %v1516_v60 = vpop.eup %1515 }
 0x207   :  { %v1518_v61 = vpop.eup %1517  ;;  %v410_v0 = vmul.f32 %v1516_v60, %v1514_v58 }
 0x208   :  { %1414 = vmatprep.mubr.bf16.mxu0 %v412_v59  ;;  %v1312_v59 = vld [vmem:[#allocation2] ss:$0 sm:$0xff] }
 0x209   :  { %v1520_v62 = vpop.eup %1519  ;;  %1415 = vmatmul.mubr.bf16.vlgmr.msra.gmra.mrb[8].mxu0 %v413_v57 }
 0x20a   :  { %v1522_v63 = vpop.eup %1521  ;;  %v411_v1 = vmul.f32 %v1520_v62, %v1518_v61 }
 0x20b   :  { %v1524_v2 = vpop.eup %1523 }
 0x20c   :  { %v1526_v3 = vpop.eup %1525  ;;  %v415_v4 = vpack.c.bf16 %v411_v1, %v410_v0  ;;  %v408_v6 = vmul.f32 %v1524_v2, %v1522_v63  ;;  %v1649_v63 = vmov 0  }
 0x20d   :  { %v1528_v5 = vpop.eup %1527  ;;  %1450 = vset.pattern.permute.xlu1 %v1649_v63  ;;  %1449 = vset.pattern.permute.xlu0 %v1649_v63 }
 0x20e   :  { %v409_v7 = vmul.f32 %v1528_v5, %v1526_v3 }
 0x210   :  { %v414_v8 = vpack.c.bf16 %v409_v7, %v408_v6 }
 0x212   :  { %1418 = vmatprep.mubr.bf16.mxu0 %v414_v8 }
 0x213   :  { %1419 = vmatmul.mubr.bf16.gmra.mrb[12].mxu0 %v415_v4 }
 0x2dc   :  { %v1416_v10 = vpop.f32.mrb[8].mxu0 }
 0x2dd   :  { %v530_v11 = vadd.f32 %v1416_v10, %v1302_v9  ;;  %v521_v12 = vpop.f32.mrb[9].mxu0 }
 0x2de   :  { %v522_v13 = vadd.f32 %v1302_v9, %v521_v12  ;;  %v1417_v14 = vpop.f32.mrb[10].mxu0 }
 0x2df   :  { %v554_v16 = vmax.f32 %v530_v11, 0.0  ;;  %v533_v17 = vadd.f32 %v1417_v14, %v1302_v9  ;;  %v524_v19 = vpop.f32.mrb[11].mxu0 }
 0x2e0   :  { %v552_v22 = vmax.f32 %v522_v13, 0.0  ;;  %v525_v28 = vadd.f32 %v1302_v9, %v524_v19 }
 0x2e1   :  { %v555_v29 = vmax.f32 %v533_v17, 0.0  ;;  %v569_v30 = vmul.f32 %v1311_v15, %v554_v16 }
 0x2e2   :  { %v553_v31 = vmax.f32 %v525_v28, 0.0  ;;  %v567_v33 = vmul.f32 %v1311_v15, %v552_v22 }
 0x2e3   :  { %579 = vadd.xlane.f32.xlu1 %v569_v30  ;;  %v570_v36 = vmul.f32 %v1311_v15, %v555_v29 }
 0x2e4   :  { %575 = vadd.xlane.f32.xlu0 %v567_v33  ;;  %v568_v43 = vmul.f32 %v1311_v15, %v553_v31 }
 0x2e6   :  { %v1420_v42 = vpop.f32.mrb[12].mxu0 }
 0x2e7   :  { %v537_v44 = vpop.f32.mrb[13].mxu0  ;;  %581 = vadd.xlane.f32.xlu1 %v570_v36  ;;  %v546_v45 = vadd.f32 %v1420_v42, %v1302_v9 }
 0x2e8   :  { %v538_v46 = vadd.f32 %v1302_v9, %v537_v44  ;;  %v1421_v47 = vpop.f32.mrb[14].mxu0  ;;  %577 = vadd.xlane.f32.xlu0 %v568_v43 }
 0x2e9   :  { %v540_v48 = vpop.f32.mrb[15].mxu0  ;;  %v549_v50 = vadd.f32 %v1421_v47, %v1302_v9  ;;  %v558_v52 = vmax.f32 %v546_v45, 0.0 }
 0x2ea   :  { %v556_v49 = vmax.f32 %v538_v46, 0.0  ;;  %v541_v51 = vadd.f32 %v1302_v9, %v540_v48 }
 0x2eb   :  { %v559_v55 = vmax.f32 %v549_v50, 0.0  ;;  %v573_v57 = vmul.f32 %v1311_v15, %v558_v52 }
 0x2ec   :  { %v557_v53 = vmax.f32 %v541_v51, 0.0  ;;  %v571_v54 = vmul.f32 %v1311_v15, %v556_v49 }
 0x2ed   :  { %v574_v58 = vmul.f32 %v1311_v15, %v559_v55 }
 0x2ee   :  { %583 = vadd.xlane.f32.xlu0 %v571_v54  ;;  %v572_v56 = vmul.f32 %v1311_v15, %v557_v53 }
 0x2f0   :  { %585 = vadd.xlane.f32.xlu1 %v572_v56 }
 0x2f2   :  { %587 = vadd.xlane.f32.xlu0 %v573_v57 }
 0x2f4   :  { %589 = vadd.xlane.f32.xlu1 %v574_v58 }
 0x370   :  { %v580_v60 = vpop.xlane.xlu1 %579 }
 0x371   :  { %v600_v61 = vadd.f32 %v1312_v59, %v580_v60  ;;  %v576_v62 = vpop.xlane.xlu0 %575 }
 0x372   :  { %v598_v0 = vadd.f32 %v1312_v59, %v576_v62 }
 0x373   :  { %v621_v1 = vsel %vm606_vm1, %v600_v61, 0.0 }
 0x374   :  { %v622_v2 = vrot.slane %v621_v1, 4  ;;  %v607_v3 = vsel %vm606_vm1, %v598_v0, 0.0  ;;  %v582_v4 = vpop.xlane.xlu1 %581 }
 0x375   :  { %v608_v5 = vrot.slane %v607_v3, 4  ;;  %v601_v6 = vadd.f32 %v1312_v59, %v582_v4  ;;  %v578_v7 = vpop.xlane.xlu0 %577 }
 0x376   :  { %v623_v8 = vadd.f32 %v622_v2, %v621_v1  ;;  %v599_v9 = vadd.f32 %v1312_v59, %v578_v7 }
 0x377   :  { %v609_v10 = vadd.f32 %v608_v5, %v607_v3  ;;  %v628_v11 = vsel %vm606_vm1, %v601_v6, 0.0 }
 0x378   :  { %v624_v12 = vrot.slane %v623_v8, 2  ;;  %v629_v13 = vrot.slane %v628_v11, 4  ;;  %v614_v14 = vsel %vm606_vm1, %v599_v9, 0.0 }
 0x379   :  { %v610_v15 = vrot.slane %v609_v10, 2  ;;  %v615_v16 = vrot.slane %v614_v14, 4 }
 0x37a   :  { %v625_v17 = vadd.f32 %v624_v12, %v623_v8  ;;  %v630_v19 = vadd.f32 %v629_v13, %v628_v11 }
 0x37b   :  { %v611_v22 = vadd.f32 %v610_v15, %v609_v10  ;;  %v616_v28 = vadd.f32 %v615_v16, %v614_v14  ;;  %v584_v29 = vpop.xlane.xlu0 %583 }
 0x37c   :  { %v626_v30 = vrot.slane %v625_v17, 1  ;;  %v631_v31 = vrot.slane %v630_v19, 2  ;;  %v1846_v33 = vadd.f32 %v1312_v59, %v584_v29 }
 0x37d   :  { %v612_v36 = vrot.slane %v611_v22, 1  ;;  %v617_v42 = vrot.slane %v616_v28, 2  ;;  %v586_v43 = vpop.xlane.xlu1 %585 }
 0x37e   :  { %v627_v44 = vadd.f32 %v626_v30, %v625_v17  ;;  %v632_v45 = vadd.f32 %v631_v31, %v630_v19  ;;  %v635_v46 = vsel %vm606_vm1, %v1846_v33, 0.0  ;;  %v1850_v47 = vadd.f32 %v1312_v59, %v586_v43 }
 0x37f   :  { %v613_v48 = vadd.f32 %v612_v36, %v611_v22  ;;  %v618_v49 = vadd.f32 %v617_v42, %v616_v28  ;;  %v636_v50 = vrot.slane %v635_v46, 4  ;;  %v588_v51 = vpop.xlane.xlu0 %587 }
 0x380   :  { %v666_v52 = vmul.f32 0.125, %v627_v44  ;;  %v633_v53 = vrot.slane %v632_v45, 1  ;;  %v642_v54 = vsel %vm606_vm1, %v1850_v47, 0.0  ;;  %v1854_v55 = vadd.f32 %v1312_v59, %v588_v51 }
 0x381   :  { %v664_v56 = vmul.f32 0.125, %v613_v48  ;;  %v619_v57 = vrot.slane %v618_v49, 1  ;;  %v637_v58 = vadd.f32 %v636_v50, %v635_v46  ;;  %v643_v60 = vrot.slane %v642_v54, 4  ;;  %v590_v62 = vpop.xlane.xlu1 %589 }
 0x382   :  { %v1856_v63 = vsub.f32 %v600_v61, %v666_v52  ;;  %v634_v1 = vadd.f32 %v633_v53, %v632_v45  ;;  %v649_v2 = vsel %vm606_vm1, %v1854_v55, 0.0  ;;  %v1860_v3 = vadd.f32 %v1312_v59, %v590_v62 }
 0x383   :  { %v1862_v4 = vsub.f32 %v598_v0, %v664_v56  ;;  %v620_v5 = vadd.f32 %v619_v57, %v618_v49  ;;  %v638_v7 = vrot.slane %v637_v58, 2  ;;  %v644_v8 = vadd.f32 %v643_v60, %v642_v54 }
 0x384   :  { %v682_v10 = vmul.f32 %v1856_v63, %v1856_v63  ;;  %v667_v11 = vmul.f32 0.125, %v634_v1  ;;  %v650_v12 = vrot.slane %v649_v2, 4  ;;  %v656_v61 = vsel %vm606_vm1, %v1860_v3, 0.0 }
 0x385   :  { %v680_v13 = vmul.f32 %v1862_v4, %v1862_v4  ;;  %v665_v14 = vmul.f32 0.125, %v620_v5  ;;  %v639_v15 = vadd.f32 %v638_v7, %v637_v58  ;;  %v645_v59 = vrot.slane %v644_v8, 2 }
 0x386   :  { %v702_v0 = vsel %vm606_vm1, %v682_v10, 0.0  ;;  %v1871_v16 = vsub.f32 %v601_v6, %v667_v11  ;;  %v651_v17 = vadd.f32 %v650_v12, %v649_v2  ;;  %v657_v19 = vrot.slane %v656_v61, 4 }
 0x387   :  { %v703_v22 = vrot.slane %v702_v0, 4  ;;  %v688_v28 = vsel %vm606_vm1, %v680_v13, 0.0  ;;  %v1874_v29 = vsub.f32 %v599_v9, %v665_v14  ;;  %v640_v30 = vrot.slane %v639_v15, 1 }
 0x388   :  { %v689_v31 = vrot.slane %v688_v28, 4  ;;  %v683_v36 = vmul.f32 %v1871_v16, %v1871_v16  ;;  %v646_v42 = vadd.f32 %v645_v59, %v644_v8  ;;  %v652_v43 = vrot.slane %v651_v17, 2 }
 0x389   :  { %v704_v44 = vadd.f32 %v703_v22, %v702_v0  ;;  %v681_v45 = vmul.f32 %v1874_v29, %v1874_v29  ;;  %v641_v6 = vadd.f32 %v640_v30, %v639_v15  ;;  %v658_v46 = vadd.f32 %v657_v19, %v656_v61 }
 0x38a   :  { %v690_v48 = vadd.f32 %v689_v31, %v688_v28  ;;  %v709_v49 = vsel %vm606_vm1, %v683_v36, 0.0  ;;  %v647_v50 = vrot.slane %v646_v42, 1  ;;  %v653_v51 = vadd.f32 %v652_v43, %v651_v17 }
 0x38b   :  { %v705_v9 = vrot.slane %v704_v44, 2  ;;  %v710_v52 = vrot.slane %v709_v49, 4  ;;  %v695_v53 = vsel %vm606_vm1, %v681_v45, 0.0  ;;  %v668_v54 = vmul.f32 0.125, %v641_v6 }
 0x38c   :  { %v691_v56 = vrot.slane %v690_v48, 2  ;;  %v696_v57 = vrot.slane %v695_v53, 4  ;;  %v648_v58 = vadd.f32 %v647_v50, %v646_v42  ;;  %v654_v60 = vrot.slane %v653_v51, 1 }
 0x38d   :  { %v706_v62 = vadd.f32 %v705_v9, %v704_v44  ;;  %v711_v1 = vadd.f32 %v710_v52, %v709_v49  ;;  %v1883_v2 = vsub.f32 %v1846_v33, %v668_v54  ;;  %v659_v5 = vrot.slane %v658_v46, 2 }
 0x38e   :  { %v692_v7 = vadd.f32 %v691_v56, %v690_v48  ;;  %v697_v8 = vadd.f32 %v696_v57, %v695_v53  ;;  %v669_v10 = vmul.f32 0.125, %v648_v58  ;;  %v655_v11 = vadd.f32 %v654_v60, %v653_v51 }
 0x38f   :  { %v707_v12 = vrot.slane %v706_v62, 1  ;;  %v712_v61 = vrot.slane %v711_v1, 2  ;;  %v684_v13 = vmul.f32 %v1883_v2, %v1883_v2  ;;  %v660_v14 = vadd.f32 %v659_v5, %v658_v46 }
 0x390   :  { %v693_v15 = vrot.slane %v692_v7, 1  ;;  %v698_v59 = vrot.slane %v697_v8, 2  ;;  %v1888_v0 = vsub.f32 %v1850_v47, %v669_v10  ;;  %v670_v17 = vmul.f32 0.125, %v655_v11 }
 0x391   :  { %v708_v19 = vadd.f32 %v707_v12, %v706_v62  ;;  %v713_v33 = vadd.f32 %v712_v61, %v711_v1  ;;  %v716_v22 = vsel %vm606_vm1, %v684_v13, 0.0  ;;  %v661_v28 = vrot.slane %v660_v14, 1 }
 0x392   :  { %v694_v30 = vadd.f32 %v693_v15, %v692_v7  ;;  %v699_v31 = vadd.f32 %v698_v59, %v697_v8  ;;  %v717_v36 = vrot.slane %v716_v22, 4  ;;  %v685_v42 = vmul.f32 %v1888_v0, %v1888_v0 }
 0x393   :  { %v747_v43 = vmul.f32 0.14285715, %v708_v19  ;;  %v714_v44 = vrot.slane %v713_v33, 1  ;;  %v1894_v45 = vsub.f32 %v1854_v55, %v670_v17  ;;  %v662_v6 = vadd.f32 %v661_v28, %v660_v14 }
 0x394   :  { %v745_v47 = vmul.f32 0.14285715, %v694_v30  ;;  %v700_v46 = vrot.slane %v699_v31, 1  ;;  %v718_v48 = vadd.f32 %v717_v36, %v716_v22  ;;  %v723_v49 = vsel %vm606_vm1, %v685_v42, 0.0 }
 0x395   :  { %1529 = vrsqrt.f32 %v747_v43  ;;  %v715_v50 = vadd.f32 %v714_v44, %v713_v33  ;;  %v724_v52 = vrot.slane %v723_v49, 4  ;;  %v686_v53 = vmul.f32 %v1894_v45, %v1894_v45 }
 0x396   :  { %1531 = vrsqrt.f32 %v745_v47  ;;  %v701_v51 = vadd.f32 %v700_v46, %v699_v31  ;;  %v719_v9 = vrot.slane %v718_v48, 2  ;;  %v671_v54 = vmul.f32 0.125, %v662_v6 }
 0x397   :  { %v748_v56 = vmul.f32 0.14285715, %v715_v50  ;;  %v725_v58 = vadd.f32 %v724_v52, %v723_v49  ;;  %v730_v60 = vsel %vm606_vm1, %v686_v53, 0.0  ;;  %vm769_vm2 = vcmp.eq.f32.partialorder %v747_v43, inf }
 0x398   :  { %v746_v57 = vmul.f32 0.14285715, %v701_v51  ;;  %v720_v55 = vadd.f32 %v719_v9, %v718_v48  ;;  %v1901_v62 = vsub.f32 %v1860_v3, %v671_v54  ;;  %v731_v7 = vrot.slane %v730_v60, 4 }
 0x399   :  { %1533 = vrsqrt.f32 %v748_v56  ;;  %v726_v5 = vrot.slane %v725_v58, 2  ;;  %vm771_vm3 = vcmp.eq.f32.partialorder %v747_v43, 0.0  ;;  %v772_v3 = vand.u32 2147483648, %v747_v43 }
 0x39a   :  { %1535 = vrsqrt.f32 %v746_v57  ;;  %v721_v1 = vrot.slane %v720_v55, 1  ;;  %v687_v8 = vmul.f32 %v1901_v62, %v1901_v62  ;;  %v732_v61 = vadd.f32 %v731_v7, %v730_v60 }
 0x39b   :  { %v727_v12 = vadd.f32 %v726_v5, %v725_v58  ;;  %vm755_vm4 = vcmp.eq.f32.partialorder %v745_v47, inf  ;;  %v758_v30 = vand.u32 2147483648, %v745_v47  ;;  %vm757_vm5 = vcmp.eq.f32.partialorder %v745_v47, 0.0 }
 0x39c   :  { %v722_v11 = vadd.f32 %v721_v1, %v720_v55  ;;  %v737_v13 = vsel %vm606_vm1, %v687_v8, 0.0  ;;  %v733_v22 = vrot.slane %v732_v61, 2  ;;  %vm776_vm6 = vcmp.eq.f32.partialorder %v748_v56, inf }
 0x39d   :  { %v738_v59 = vrot.slane %v737_v13, 4  ;;  %v728_v33 = vrot.slane %v727_v12, 1  ;;  %vm778_vm7 = vcmp.eq.f32.partialorder %v748_v56, 0.0  ;;  %vm762_vm8 = vcmp.eq.f32.partialorder %v746_v57, inf }
 0x39e   :  { %v749_v19 = vmul.f32 0.14285715, %v722_v11  ;;  %v734_v50 = vadd.f32 %v733_v22, %v732_v61  ;;  %vm764_vm9 = vcmp.eq.f32.partialorder %v746_v57, 0.0 }
 0x39f   :  { %v1530_v10 = vpop.eup %1529  ;;  %v739_v31 = vadd.f32 %v738_v59, %v737_v13  ;;  %v729_v49 = vadd.f32 %v728_v33, %v727_v12 }
 0x3a0   :  { %v1532_v14 = vpop.eup %1531  ;;  %v768_v15 = vmul.f32 %v1530_v10, %v747_v43  ;;  %1537 = vrsqrt.f32 %v749_v19  ;;  %v735_v55 = vrot.slane %v734_v50, 1  ;;  %vm783_vm10 = vcmp.eq.f32.partialorder %v749_v19, inf }
 0x3a1   :  { %v754_v17 = vmul.f32 %v1532_v14, %v745_v47  ;;  %v740_v51 = vrot.slane %v739_v31, 2  ;;  %v750_v54 = vmul.f32 0.14285715, %v729_v49  ;;  %vm785_vm11 = vcmp.eq.f32.partialorder %v749_v19, 0.0 }
 0x3a2   :  { %v770_v28 = vsel %vm769_vm2, %v747_v43, %v768_v15  ;;  %v779_v43 = vand.u32 2147483648, %v748_v56  ;;  %v736_v11 = vadd.f32 %v735_v55, %v734_v50 }
 0x3a3   :  { %v773_v36 = vsel %vm771_vm3, %v772_v3, %v770_v28  ;;  %v756_v42 = vsel %vm755_vm4, %v745_v47, %v754_v17  ;;  %v1534_v46 = vpop.eup %1533  ;;  %v765_v47 = vand.u32 2147483648, %v746_v57  ;;  %v741_v60 = vadd.f32 %v740_v51, %v739_v31 }
 0x3a4   :  { %v811_v44 = vadd.f32 1e-08, %v773_v36  ;;  %v759_v6 = vsel %vm757_vm5, %v758_v30, %v756_v42  ;;  %v1536_v9 = vpop.eup %1535  ;;  %v775_v52 = vmul.f32 %v1534_v46, %v748_v56  ;;  %v751_v13 = vmul.f32 0.14285715, %v736_v11 }
 0x3a5   :  { %v809_v48 = vadd.f32 1e-08, %v759_v6  ;;  %v761_v53 = vmul.f32 %v1536_v9, %v746_v57  ;;  %v742_v12 = vrot.slane %v741_v60, 1  ;;  %vm790_vm12 = vcmp.eq.f32.partialorder %v750_v54, inf }
 0x3a6   :  { %1539 = vrcp.f32 %v811_v44  ;;  %v777_v58 = vsel %vm776_vm6, %v748_v56, %v775_v52  ;;  %v786_v56 = vand.u32 2147483648, %v749_v19  ;;  %v793_v6 = vand.u32 2147483648, %v750_v54 }
 0x3a7   :  { %1541 = vrcp.f32 %v809_v48  ;;  %v780_v1 = vsel %vm778_vm7, %v779_v43, %v777_v58  ;;  %v763_v5 = vsel %vm762_vm8, %v746_v57, %v761_v53  ;;  %v743_v14 = vadd.f32 %v742_v12, %v741_v60 }
 0x3a8   :  { %1543 = vrsqrt.f32 %v750_v54  ;;  %v812_v7 = vadd.f32 1e-08, %v780_v1  ;;  %v766_v8 = vsel %vm764_vm9, %v765_v47, %v763_v5  ;;  %vm792_vm13 = vcmp.eq.f32.partialorder %v750_v54, 0.0 }
 0x3a9   :  { %v810_v10 = vadd.f32 1e-08, %v766_v8  ;;  %v1906_v17 = vmul.f32 0.14285715, %v743_v14  ;;  %vm797_vm14 = vcmp.eq.f32.partialorder %v751_v13, inf  ;;  %vm799_vm15 = vcmp.eq.f32.partialorder %v751_v13, 0.0 }
 0x3aa   :  { %1545 = vrcp.f32 %v812_v7  ;;  %v1538_v61 = vpop.eup %1537  ;;  %v800_v60 = vand.u32 2147483648, %v751_v13  ;;  %vm1136_vm3 = vcmask 1041409   ;;  %vm1138_vm4 = vcmask 1042434  }
 0x3ab   :  { %1547 = vrcp.f32 %v810_v10  ;;  %v782_v15 = vmul.f32 %v1538_v61, %v749_v19  ;;  %vm804_vm0 = vcmp.eq.f32.partialorder %v1906_v17, inf  ;;  %vm806_vm2 = vcmp.eq.f32.partialorder %v1906_v17, 0.0 }
 0x3ac   :  { %1549 = vrsqrt.f32 %v751_v13  ;;  %vm1140_vm5 = vcmask 1043459   ;;  %vm1142_vm6 = vcmask 1044484   ;;  %vm1144_vm7 = vcmask 1045509  }
 0x3ad   :  { %v784_v59 = vsel %vm783_vm10, %v749_v19, %v782_v15  ;;  %1551 = vrsqrt.f32 %v1906_v17  ;;  %vm1146_vm8 = vcmask 1046534   ;;  %vm1148_vm9 = vcmask 1047559  }
 0x3ae   :  { %v787_v22 = vsel %vm785_vm11, %v786_v56, %v784_v59 }
 0x3af   :  { %v813_v30 = vadd.f32 1e-08, %v787_v22  ;;  %v807_v22 = vand.u32 2147483648, %v1906_v17 }
 0x3b0   :  { %v1540_v3 = vpop.eup %1539 }
 0x3b1   :  { %v1542_v57 = vpop.eup %1541  ;;  %v822_v33 = vmul.f32 %v1540_v3, %v1856_v63  ;;  %1553 = vrcp.f32 %v813_v30 }
 0x3b2   :  { %v818_v28 = vmul.f32 %v1542_v57, %v1862_v4  ;;  %v1544_v31 = vpop.eup %1543 }
 0x3b3   :  { %v1911_v36 = vmul.f32 0.088388346, %v822_v33  ;;  %v789_v44 = vmul.f32 %v1544_v31, %v750_v54 }
 0x3b4   :  { %v1913_v42 = vmul.f32 0.088388346, %v818_v28  ;;  %v1546_v46 = vpop.eup %1545 }
 0x3b5   :  { %v855_v19 = vsel %vm606_vm1, %v1911_v36, -inf  ;;  %v791_v48 = vsel %vm790_vm12, %v750_v54, %v789_v44  ;;  %v1548_v49 = vpop.eup %1547  ;;  %v824_v51 = vmul.f32 %v1546_v46, %v1871_v16 }
 0x3b6   :  { %v856_v63 = vrot.slane %v855_v19, 4  ;;  %v841_v4 = vsel %vm606_vm1, %v1913_v42, -inf  ;;  %v794_v9 = vsel %vm792_vm13, %v793_v6, %v791_v48  ;;  %v820_v43 = vmul.f32 %v1548_v49, %v1874_v29  ;;  %v1550_v55 = vpop.eup %1549 }
 0x3b7   :  { %v842_v50 = vrot.slane %v841_v4, 4  ;;  %v814_v53 = vadd.f32 1e-08, %v794_v9  ;;  %v836_v47 = vmul.f32 0.088388346, %v824_v51  ;;  %v796_v7 = vmul.f32 %v1550_v55, %v751_v13  ;;  %v1552_v16 = vpop.eup %1551 }
 0x3b8   :  { %v857_v52 = vmax.f32 %v855_v19, %v856_v63  ;;  %v834_v5 = vmul.f32 0.088388346, %v820_v43  ;;  %v803_v56 = vmul.f32 %v1552_v16, %v1906_v17 }
 0x3b9   :  { %v843_v58 = vmax.f32 %v841_v4, %v842_v50  ;;  %1555 = vrcp.f32 %v814_v53  ;;  %v862_v8 = vsel %vm606_vm1, %v836_v47, -inf  ;;  %v798_v12 = vsel %vm797_vm14, %v751_v13, %v796_v7 }
 0x3ba   :  { %v858_v1 = vrot.slane %v857_v52, 2  ;;  %v863_v10 = vrot.slane %v862_v8, 4  ;;  %v848_v11 = vsel %vm606_vm1, %v834_v5, -inf  ;;  %v801_v15 = vsel %vm799_vm15, %v800_v60, %v798_v12 }
 0x3bb   :  { %v844_v54 = vrot.slane %v843_v58, 2  ;;  %v849_v14 = vrot.slane %v848_v11, 4  ;;  %v1554_v3 = vpop.eup %1553  ;;  %v815_v33 = vadd.f32 1e-08, %v801_v15  ;;  %v805_v44 = vsel %vm804_vm0, %v1906_v17, %v803_v56 }
 0x3bc   :  { %v859_v29 = vmax.f32 %v857_v52, %v858_v1  ;;  %v864_v57 = vmax.f32 %v862_v8, %v863_v10  ;;  %v826_v31 = vmul.f32 %v1554_v3, %v1883_v2  ;;  %v808_v13 = vsel %vm806_vm2, %v807_v22, %v805_v44 }
 0x3bd   :  { %v845_v61 = vmax.f32 %v843_v58, %v844_v54  ;;  %v850_v30 = vmax.f32 %v848_v11, %v849_v14  ;;  %1557 = vrcp.f32 %v815_v33  ;;  %v816_v48 = vadd.f32 1e-08, %v808_v13 }
 0x3be   :  { %v860_v59 = vrot.slane %v859_v29, 1  ;;  %v865_v6 = vrot.slane %v864_v57, 2  ;;  %v837_v4 = vmul.f32 0.088388346, %v826_v31 }
 0x3bf   :  { %v846_v28 = vrot.slane %v845_v61, 1  ;;  %v851_v63 = vrot.slane %v850_v30, 2  ;;  %1559 = vrcp.f32 %v816_v48 }
 0x3c0   :  { %v861_v19 = vmax.f32 %v859_v29, %v860_v59  ;;  %v866_v50 = vmax.f32 %v864_v57, %v865_v6  ;;  %v869_v9 = vsel %vm606_vm1, %v837_v4, -inf }
 0x3c1   :  { %v847_v46 = vmax.f32 %v845_v61, %v846_v28  ;;  %v852_v2 = vmax.f32 %v850_v30, %v851_v63  ;;  %v870_v55 = vrot.slane %v869_v9, 4 }
 0x3c2   :  { %v899_v49 = vsub.f32 %v1911_v36, %v861_v19  ;;  %v867_v53 = vrot.slane %v866_v50, 1 }
 0x3c3   :  { %v897_v51 = vsub.f32 %v1913_v42, %v847_v46  ;;  %v1556_v52 = vpop.eup %1555  ;;  %v853_v17 = vrot.slane %v852_v2, 1  ;;  %v871_v7 = vmax.f32 %v869_v9, %v870_v55 }
 0x3c4   :  { %v909_v43 = vmul.f32 1.442695, %v899_v49  ;;  %v828_v60 = vmul.f32 %v1556_v52, %v1888_v0  ;;  %v868_v1 = vmax.f32 %v866_v50, %v867_v53 }
 0x3c5   :  { %v905_v58 = vmul.f32 1.442695, %v897_v51  ;;  %v854_v36 = vmax.f32 %v852_v2, %v853_v17  ;;  %v872_v42 = vrot.slane %v871_v7, 2 }
 0x3c6   :  { %1561 = vpow2.f32 %v909_v43  ;;  %v838_v54 = vmul.f32 0.088388346, %v828_v60  ;;  %v900_v8 = vsub.f32 %v836_v47, %v868_v1 }
 0x3c7   :  { %1563 = vpow2.f32 %v905_v58  ;;  %v898_v16 = vsub.f32 %v834_v5, %v854_v36  ;;  %v1558_v10 = vpop.eup %1557  ;;  %v873_v12 = vmax.f32 %v871_v7, %v872_v42 }
 0x3c8   :  { %v876_v29 = vsel %vm606_vm1, %v838_v54, -inf  ;;  %v911_v11 = vmul.f32 1.442695, %v900_v8  ;;  %v830_v15 = vmul.f32 %v1558_v10, %v1894_v45 }
 0x3c9   :  { %v877_v61 = vrot.slane %v876_v29, 4  ;;  %v907_v14 = vmul.f32 1.442695, %v898_v16  ;;  %v874_v0 = vrot.slane %v873_v12, 1  ;;  %v1560_v3 = vpop.eup %1559 }
 0x3ca   :  { %1565 = vpow2.f32 %v911_v11  ;;  %v839_v59 = vmul.f32 0.088388346, %v830_v15  ;;  %v832_v47 = vmul.f32 %v1560_v3, %v1901_v62 }
 0x3cb   :  { %v878_v56 = vmax.f32 %v876_v29, %v877_v61  ;;  %1567 = vpow2.f32 %v907_v14  ;;  %v875_v57 = vmax.f32 %v873_v12, %v874_v0 }
 0x3cc   :  { %v883_v5 = vsel %vm606_vm1, %v839_v59, -inf  ;;  %v840_v44 = vmul.f32 0.088388346, %v832_v47 }
 0x3cd   :  { %v879_v33 = vrot.slane %v878_v56, 2  ;;  %v901_v28 = vsub.f32 %v837_v4, %v875_v57  ;;  %v884_v31 = vrot.slane %v883_v5, 4 }
 0x3ce   :  { %v890_v49 = vsel %vm606_vm1, %v840_v44, -inf }
 0x3cf   :  { %v880_v30 = vmax.f32 %v878_v56, %v879_v33  ;;  %v913_v46 = vmul.f32 1.442695, %v901_v28  ;;  %v885_v48 = vmax.f32 %v883_v5, %v884_v31  ;;  %v891_v50 = vrot.slane %v890_v49, 4 }
 0x3d0   :  { %v1943_v22 = vpop.eup %1561 }
 0x3d1   :  { %v1945_v19 = vpop.eup %1563  ;;  %v935_v45 = vsel %vm606_vm1, %v1943_v22, 0.0  ;;  %v881_v63 = vrot.slane %v880_v30, 1  ;;  %1569 = vpow2.f32 %v913_v46  ;;  %v886_v2 = vrot.slane %v885_v48, 2 }
 0x3d2   :  { %v936_v6 = vrot.slane %v935_v45, 4  ;;  %v921_v13 = vsel %vm606_vm1, %v1945_v19, 0.0  ;;  %v892_v53 = vmax.f32 %v890_v49, %v891_v50 }
 0x3d3   :  { %v922_v62 = vrot.slane %v921_v13, 4  ;;  %v882_v4 = vmax.f32 %v880_v30, %v881_v63  ;;  %v887_v60 = vmax.f32 %v885_v48, %v886_v2 }
 0x3d4   :  { %v937_v51 = vadd.f32 %v936_v6, %v935_v45  ;;  %v1952_v52 = vpop.eup %1565  ;;  %v893_v42 = vrot.slane %v892_v53, 2 }
 0x3d5   :  { %v923_v9 = vadd.f32 %v922_v62, %v921_v13  ;;  %v902_v43 = vsub.f32 %v838_v54, %v882_v4  ;;  %v1954_v58 = vpop.eup %1567  ;;  %v942_v17 = vsel %vm606_vm1, %v1952_v52, 0.0  ;;  %v888_v29 = vrot.slane %v887_v60, 1 }
 0x3d6   :  { %v938_v55 = vrot.slane %v937_v51, 2  ;;  %v943_v7 = vrot.slane %v942_v17, 4  ;;  %v928_v36 = vsel %vm606_vm1, %v1954_v58, 0.0  ;;  %v894_v54 = vmax.f32 %v892_v53, %v893_v42 }
 0x3d7   :  { %v924_v1 = vrot.slane %v923_v9, 2  ;;  %v915_v8 = vmul.f32 1.442695, %v902_v43  ;;  %v929_v16 = vrot.slane %v928_v36, 4  ;;  %v889_v61 = vmax.f32 %v887_v60, %v888_v29 }
 0x3d8   :  { %v939_v10 = vadd.f32 %v938_v55, %v937_v51  ;;  %v944_v12 = vadd.f32 %v943_v7, %v942_v17  ;;  %v895_v56 = vrot.slane %v894_v54, 1 }
 0x3d9   :  { %v925_v11 = vadd.f32 %v924_v1, %v923_v9  ;;  %1571 = vpow2.f32 %v915_v8  ;;  %v930_v0 = vadd.f32 %v929_v16, %v928_v36  ;;  %v903_v57 = vsub.f32 %v839_v59, %v889_v61 }
 0x3da   :  { %v940_v14 = vrot.slane %v939_v10, 1  ;;  %v945_v3 = vrot.slane %v944_v12, 2  ;;  %v896_v30 = vmax.f32 %v894_v54, %v895_v56 }
 0x3db   :  { %v926_v15 = vrot.slane %v925_v11, 1  ;;  %v931_v5 = vrot.slane %v930_v0, 2  ;;  %v1960_v28 = vpop.eup %1569  ;;  %v917_v45 = vmul.f32 1.442695, %v903_v57 }
 0x3dc   :  { %v941_v33 = vadd.f32 %v940_v14, %v939_v10  ;;  %v946_v31 = vadd.f32 %v945_v3, %v944_v12  ;;  %v949_v13 = vsel %vm606_vm1, %v1960_v28, 0.0  ;;  %v904_v46 = vsub.f32 %v840_v44, %v896_v30 }
 0x3dd   :  { %v927_v47 = vadd.f32 %v926_v15, %v925_v11  ;;  %v932_v6 = vadd.f32 %v931_v5, %v930_v0  ;;  %v950_v49 = vrot.slane %v949_v13, 4 }
 0x3de   :  { %1573 = vrcp.f32 %v941_v33  ;;  %v947_v63 = vrot.slane %v946_v31, 1  ;;  %v919_v48 = vmul.f32 1.442695, %v904_v46 }
 0x3df   :  { %1575 = vrcp.f32 %v927_v47  ;;  %v933_v62 = vrot.slane %v932_v6, 1  ;;  %v951_v9 = vadd.f32 %v950_v49, %v949_v13 }
 0x3e0   :  { %1577 = vpow2.f32 %v917_v45  ;;  %v948_v59 = vadd.f32 %v947_v63, %v946_v31  ;;  %v1473_v63 = vld [vmem:[#allocation5] sm:$0xff]  }
 0x3e1   :  { %v934_v4 = vadd.f32 %v933_v62, %v932_v6  ;;  %1579 = vpow2.f32 %v919_v48  ;;  %v952_v60 = vrot.slane %v951_v9, 2  ;;  %v1650_v62 = vmov 0.0  }
 0x3e2   :  { %1581 = vrcp.f32 %v948_v59  ;;  %1422 = vmatprep.subr.bf16.mxu1 %v1650_v62  ;;  %v1474_v59 = vld [vmem:[#allocation5 + $0x8] sm:$0xff]  }
 0x3e3   :  { %v1572_v50 = vpop.eup %1571  ;;  %1583 = vrcp.f32 %v934_v4  ;;  %v953_v10 = vadd.f32 %v952_v60, %v951_v9  ;;  %1423 = vmatpush3.bf16.msra.mxu1 %v1473_v63  ;;  %v1476_v9 = vld [vmem:[#allocation5 + $0x18] sm:$0xff]  }
 0x3e4   :  { %v956_v51 = vsel %vm606_vm1, %v1572_v50, 0.0  ;;  %1424 = vmatprep.subr.bf16.mxu1 %v1650_v62 }
 0x3e5   :  { %v957_v2 = vrot.slane %v956_v51, 4  ;;  %v954_v15 = vrot.slane %v953_v10, 1 }
 0x3e7   :  { %v958_v1 = vadd.f32 %v957_v2, %v956_v51  ;;  %v955_v47 = vadd.f32 %v954_v15, %v953_v10  ;;  %1425 = vmatpush3.bf16.msra.mxu1 %v1474_v59  ;;  %v1475_v51 = vld [vmem:[#allocation5 + $0x10] sm:$0xff]  }
 0x3e8   :  { %v1574_v43 = vpop.eup %1573  ;;  %1426 = vmatprep.subr.bf16.mxu1 %v1650_v62 }
 0x3e9   :  { %v1576_v53 = vpop.eup %1575  ;;  %v982_v44 = vmul.f32 %v1574_v43, %v1943_v22  ;;  %v959_v11 = vrot.slane %v958_v1, 2  ;;  %v1478_v43 = vld [vmem:[#allocation5 + $0x28] sm:$0xff]  }
 0x3ea   :  { %v1578_v55 = vpop.eup %1577  ;;  %v978_v17 = vmul.f32 %v1576_v53, %v1945_v19  ;;  %v1479_v53 = vld [vmem:[#allocation5 + $0x30] sm:$0xff]  }
 0x3eb   :  { %v963_v7 = vsel %vm606_vm1, %v1578_v55, 0.0  ;;  %1005 = vperm.xlu1 %1450, %v982_v44   ;;  %v1580_v8 = vpop.eup %1579  ;;  %v960_v0 = vadd.f32 %v959_v11, %v958_v1  ;;  %1427 = vmatpush3.bf16.msra.mxu1 %v1475_v51 }
 0x3ec   :  { %v964_v36 = vrot.slane %v963_v7, 4  ;;  %995 = vperm.xlu0 %1449, %v978_v17   ;;  %v1582_v42 = vpop.eup %1581  ;;  %v970_v16 = vsel %vm606_vm1, %v1580_v8, 0.0  ;;  %1428 = vmatprep.subr.bf16.mxu1 %v1650_v62  ;;  %vm1651_vm1 = vmmov 0  }
 0x3ed   :  { %v971_v54 = vrot.slane %v970_v16, 4  ;;  %v984_v22 = vmul.f32 %v1582_v42, %v1952_v52  ;;  %v1584_v12 = vpop.eup %1583  ;;  %v961_v5 = vrot.slane %v960_v0, 1  ;;  %1438 = vmatprep.mubr.msk.bf16.mxu1 %vm1651_vm1, %v1650_v62 }
 0x3ee   :  { %v965_v29 = vadd.f32 %v964_v36, %v963_v7  ;;  %v980_v56 = vmul.f32 %v1584_v12, %v1954_v58 }
 0x3ef   :  { %1010 = vperm.xlu1 %1450, %v984_v22   ;;  %v972_v19 = vadd.f32 %v971_v54, %v970_v16  ;;  %v962_v31 = vadd.f32 %v961_v5, %v960_v0  ;;  %1429 = vmatpush3.bf16.msra.mxu1 %v1476_v9 }
 0x3f0   :  { %v966_v61 = vrot.slane %v965_v29, 2  ;;  %1430 = vmatprep.subr.bf16.mxu1 %v1650_v62 }
 0x3f1   :  { %v973_v3 = vrot.slane %v972_v19, 2 }
 0x3f2   :  { %v967_v14 = vadd.f32 %v966_v61, %v965_v29 }
 0x3f3   :  { %1000 = vperm.xlu1 %1450, %v980_v56   ;;  %v974_v30 = vadd.f32 %v973_v3, %v972_v19 }
 0x3f4   :  { %v968_v57 = vrot.slane %v967_v14, 1 }
 0x3f5   :  { %v975_v52 = vrot.slane %v974_v30, 1 }
 0x3f6   :  { %v969_v33 = vadd.f32 %v968_v57, %v967_v14 }
 0x3f7   :  { %v976_v45 = vadd.f32 %v975_v52, %v974_v30 }
 0x3f8   :  { %1585 = vrcp.f32 %v969_v33 }
 0x3f9   :  { %1587 = vrcp.f32 %v955_v47 }
 0x3fa   :  { %1589 = vrcp.f32 %v962_v31 }
 0x3fb   :  { %1591 = vrcp.f32 %v976_v45 }
 0x402   :  { %v1586_v6 = vpop.eup %1585 }
 0x403   :  { %v990_v13 = vmul.f32 %v1586_v6, %v1578_v55  ;;  %v1588_v46 = vpop.eup %1587 }
 0x404   :  { %v986_v58 = vmul.f32 %v1588_v46, %v1960_v28  ;;  %v1590_v48 = vpop.eup %1589  ;;  %v1477_v28 = vld [vmem:[#allocation5 + $0x20] sm:$0xff]  }
 0x405   :  { %1025 = vperm.xlu1 %1450, %v990_v13   ;;  %v988_v49 = vmul.f32 %v1590_v48, %v1572_v50  ;;  %v1592_v4 = vpop.eup %1591  ;;  %1431 = vmatpush3.bf16.msra.mxu1 %v1477_v28  ;;  %v1480_v50 = vld [vmem:[#allocation5 + $0x38] sm:$0xff]  }
 0x406   :  { %v992_v2 = vmul.f32 %v1592_v4, %v1580_v8  ;;  %1432 = vmatprep.subr.bf16.mxu1 %v1650_v62 }
 0x409   :  { %1015 = vperm.xlu1 %1450, %v986_v58   ;;  %1433 = vmatpush3.bf16.msra.mxu1 %v1478_v43 }
 0x40a   :  { %1434 = vmatprep.subr.bf16.mxu1 %v1650_v62 }
 0x40d   :  { %1020 = vperm.xlu1 %1450, %v988_v49   ;;  %1435 = vmatpush3.bf16.msra.mxu1 %v1479_v53 }
 0x40e   :  { %1436 = vmatprep.subr.bf16.mxu1 %v1650_v62 }
 0x411   :  { %1030 = vperm.xlu1 %1450, %v992_v2   ;;  %1437 = vmatpush3.bf16.msra.mxu1 %v1480_v50 }
 0x46a   :  { %v1006_v44 = vpop.permute.xlu1 %1005 }
 0x46b   :  { %v996_v17 = vpop.permute.xlu0 %995  ;;  %v1035_v8 = vmul.f32 %v1006_v44, %v202_v27 }
 0x46c   :  { %v1033_v1 = vmul.f32 %v996_v17, %v200_v25 }
 0x46d   :  { %v1053_v10 = vrot.slane %v1035_v8, 4 }
 0x46e   :  { %v1011_v55 = vpop.permute.xlu1 %1010  ;;  %v1041_v42 = vrot.slane %v1033_v1, 4 }
 0x46f   :  { %v1036_v16 = vmul.f32 %v1011_v55, %v203_v24  ;;  %v1054_v12 = vadd.f32 %v1053_v10, %v1035_v8 }
 0x470   :  { %v1042_v11 = vadd.f32 %v1041_v42, %v1033_v1 }
 0x471   :  { %v1059_v54 = vrot.slane %v1036_v16, 4  ;;  %v1055_v19 = vrot.slane %v1054_v12, 2 }
 0x472   :  { %v1001_v60 = vpop.permute.xlu1 %1000  ;;  %v1043_v61 = vrot.slane %v1042_v11, 2 }
 0x473   :  { %v1034_v7 = vmul.f32 %v1001_v60, %v201_v26  ;;  %v1060_v18 = vadd.f32 %v1059_v54, %v1036_v16  ;;  %v1056_v21 = vadd.f32 %v1055_v19, %v1054_v12 }
 0x474   :  { %v1044_v26 = vadd.f32 %v1043_v61, %v1042_v11 }
 0x475   :  { %v1047_v36 = vrot.slane %v1034_v7, 4  ;;  %v1061_v27 = vrot.slane %v1060_v18, 2  ;;  %v1057_v5 = vrot.slane %v1056_v21, 1 }
 0x476   :  { %v1045_v0 = vrot.slane %v1044_v26, 1 }
 0x477   :  { %v1048_v29 = vadd.f32 %v1047_v36, %v1034_v7  ;;  %v1062_v57 = vadd.f32 %v1061_v27, %v1060_v18  ;;  %v1058_v63 = vadd.f32 %v1057_v5, %v1056_v21 }
 0x478   :  { %v1046_v52 = vadd.f32 %v1045_v0, %v1044_v26 }
 0x479   :  { %v1049_v22 = vrot.slane %v1048_v29, 2  ;;  %v1091_v9 = vpack.c.bf16 %v1058_v63, %v1058_v63 }
 0x47b   :  { %v1050_v25 = vadd.f32 %v1049_v22, %v1048_v29  ;;  %v1130_v7 = vunpack.c.l.b16 %v1091_v9 }
 0x47d   :  { %v1051_v14 = vrot.slane %v1050_v25, 1 }
 0x47f   :  { %v1052_v33 = vadd.f32 %v1051_v14, %v1050_v25 }
 0x481   :  { %v1090_v6 = vpack.c.bf16 %v1052_v33, %v1052_v33  ;;  %v1254_v4 = vsel %vm1136_vm3, %v1052_v33, %v1046_v52 }
 0x482   :  { %v1255_v17 = vsel %vm1138_vm4, %v1058_v63, %v1254_v4 }
 0x483   :  { %v1129_v37 = vunpack.c.l.b16 %v1090_v6 }
 0x484   :  { %v1026_v23 = vpop.permute.xlu1 %1025 }
 0x485   :  { %v1039_v20 = vmul.f32 %v1026_v23, %v206_v41  ;;  %v1063_v41 = vrot.slane %v1062_v57, 1 }
 0x487   :  { %v1077_v15 = vrot.slane %v1039_v20, 4  ;;  %v1064_v49 = vadd.f32 %v1063_v41, %v1062_v57  ;;  %v1313_v57 = vld [vmem:[%s2019_s10] ss:$0 sm:$0xff] }
 0x488   :  { %v1016_v24 = vpop.permute.xlu1 %1015 }
 0x489   :  { %v1078_v56 = vadd.f32 %v1077_v15, %v1039_v20  ;;  %v1037_v3 = vmul.f32 %v1016_v24, %v204_v39  ;;  %v1089_v39 = vpack.c.bf16 %v1046_v52, %v1046_v52  ;;  %v1092_v55 = vpack.c.bf16 %v1064_v49, %v1064_v49 }
 0x48a   :  { %v1256_v8 = vsel %vm1140_vm5, %v1064_v49, %v1255_v17 }
 0x48b   :  { %v1065_v47 = vrot.slane %v1037_v3, 4  ;;  %v1079_v30 = vrot.slane %v1078_v56, 2  ;;  %v1128_v43 = vunpack.c.l.b16 %v1089_v39  ;;  %v1131_v54 = vunpack.c.l.b16 %v1092_v55 }
 0x48c   :  { %v1021_v31 = vpop.permute.xlu1 %1020 }
 0x48d   :  { %v1066_v45 = vadd.f32 %v1065_v47, %v1037_v3  ;;  %v1038_v34 = vmul.f32 %v1021_v31, %v205_v40  ;;  %v1080_v58 = vadd.f32 %v1079_v30, %v1078_v56  ;;  %v1137_v35 = vsel %vm1136_vm3, %v1129_v37, %v1128_v43 }
 0x48e   :  { %v1139_v29 = vsel %vm1138_vm4, %v1130_v7, %v1137_v35 }
 0x48f   :  { %v1067_v13 = vrot.slane %v1066_v45, 2  ;;  %v1071_v46 = vrot.slane %v1038_v34, 4  ;;  %v1081_v28 = vrot.slane %v1080_v58, 1  ;;  %v1141_v25 = vsel %vm1140_vm5, %v1131_v54, %v1139_v29 }
 0x490   :  { %v1031_v32 = vpop.permute.xlu1 %1030 }
 0x491   :  { %v1068_v62 = vadd.f32 %v1067_v13, %v1066_v45  ;;  %v1072_v48 = vadd.f32 %v1071_v46, %v1038_v34  ;;  %v1040_v59 = vmul.f32 %v1031_v32, %v207_v38  ;;  %v1082_v36 = vadd.f32 %v1081_v28, %v1080_v58 }
 0x493   :  { %v1069_v40 = vrot.slane %v1068_v62, 1  ;;  %v1073_v51 = vrot.slane %v1072_v48, 2  ;;  %v1083_v2 = vrot.slane %v1040_v59, 4  ;;  %v1095_v18 = vpack.c.bf16 %v1082_v36, %v1082_v36 }
 0x495   :  { %v1070_v53 = vadd.f32 %v1069_v40, %v1068_v62  ;;  %v1074_v50 = vadd.f32 %v1073_v51, %v1072_v48  ;;  %v1084_v44 = vadd.f32 %v1083_v2, %v1040_v59  ;;  %v1134_v21 = vunpack.c.l.b16 %v1095_v18 }
 0x497   :  { %v1093_v38 = vpack.c.bf16 %v1070_v53, %v1070_v53  ;;  %v1075_v60 = vrot.slane %v1074_v50, 1  ;;  %v1085_v1 = vrot.slane %v1084_v44, 2  ;;  %v1257_v11 = vsel %vm1142_vm6, %v1070_v53, %v1256_v8 }
 0x499   :  { %v1076_v42 = vadd.f32 %v1075_v60, %v1074_v50  ;;  %v1086_v16 = vadd.f32 %v1085_v1, %v1084_v44  ;;  %v1132_v10 = vunpack.c.l.b16 %v1093_v38 }
 0x49b   :  { %v1094_v22 = vpack.c.bf16 %v1076_v42, %v1076_v42  ;;  %v1258_v12 = vsel %vm1144_vm7, %v1076_v42, %v1257_v11  ;;  %v1087_v61 = vrot.slane %v1086_v16, 1  ;;  %v1143_v26 = vsel %vm1142_vm6, %v1132_v10, %v1141_v25 }
 0x49c   :  { %v1259_v20 = vsel %vm1146_vm8, %v1082_v36, %v1258_v12 }
 0x49d   :  { %v1133_v19 = vunpack.c.l.b16 %v1094_v22  ;;  %v1088_v23 = vadd.f32 %v1087_v61, %v1086_v16 }
 0x49f   :  { %v1145_v27 = vsel %vm1144_vm7, %v1133_v19, %v1143_v26  ;;  %v1096_v14 = vpack.c.bf16 %v1088_v23, %v1088_v23  ;;  %v1260_v15 = vsel %vm1148_vm9, %v1088_v23, %v1259_v20 }
 0x4a0   :  { %1262 = vst [vmem:[%s2021_s12] sm:$0xff] %v1260_v15  ;;  %v1147_v0 = vsel %vm1146_vm8, %v1134_v21, %v1145_v27 }
 0x4a1   :  { %v1135_v24 = vunpack.c.l.b16 %v1096_v14 }
 0x4a3   :  { %v1149_v56 = vsel %vm1148_vm9, %v1135_v24, %v1147_v0 }
 0x4a4   :  { %v1150_v3 = vpack.c.b16 %v1149_v56, %v1149_v56 }
 0x4a6   :  { %1439 = vmatmul.mubr.bf16.vlgmr.msra.gmra.mrb[8].mxu1 %v1150_v3 }
 0x579   :  { %v1234_v33 = vpop.f32.mrb[8].mxu1 }
 0x57a   :  { %v1235_v47 = vadd.f32 %v1313_v57, %v1234_v33  ;;  %v1440_v5 = vpop.f32.mrb[9].mxu1 }
 0x57b   :  { %v1237_v30 = vpop.f32.mrb[10].mxu1 }
 0x57c   :  { %v1322_v31 = vmul.f32 -1.442695, %v1235_v47  ;;  %v1441_v52 = vpop.f32.mrb[11].mxu1 }
 0x57e   :  { %1593 = vpow2.f32 %v1322_v31 }
 0x588   :  { %v1594_v45 = vpop.eup %1593 }
 0x589   :  { %v1243_v34 = vadd.f32 1.0, %v1594_v45 }
 0x58b   :  { %1595 = vrcp.f32 %v1243_v34 }
 0x595   :  { %v1596_v41 = vpop.eup %1595 }
 0x596   :  { %1263 = vst [vmem:[%s2020_s11] sm:$0xff] %v1596_v41 }
 0x597   :  { %1272 = vsyncpa [#allocation4], 1 }
 0x598   :  { %1273 = vsyncpa [#allocation6], 1 }

</bundles_post_ra>
